<compile_context>
chip_gen: v7x
topology: tpu7x:2x2x1
jax: 0.10.0
libtpu: 0.0.40
codegen_flags: <defaults>
</compile_context>

<pallas_src>
import jax
import jax.numpy as jnp
from jax.experimental import pallas as pl
from jax.experimental.pallas import tpu as pltpu

IN_DIM = 784
H1 = 512
H2 = 256
OUT_DIM = 10
OUT_PAD = 128         # lane-dense output store (unmasked vst)


def _round_up(x, m):
    return ((x + m - 1) // m) * m


def fnet_kernel(x_ref, w1_ref, b1_ref, w2_ref, b2_ref, w3_ref, b3_ref, o_ref):
    # Cast x to bf16 in-kernel (VPU) so the wrapper never materializes a
    # padded/converted copy of x in HBM.
    x = x_ref[...].astype(jnp.bfloat16)
    # fc1: bf16 x bf16 -> f32 accumulate, bias + ReLU in f32 on the VPU.
    h1 = jnp.dot(x, w1_ref[...], preferred_element_type=jnp.float32)
    h1 = jnp.maximum(h1 + b1_ref[...], 0.0).astype(jnp.bfloat16)
    # fc2
    h2 = jnp.dot(h1, w2_ref[...], preferred_element_type=jnp.float32)
    h2 = jnp.maximum(h2 + b2_ref[...], 0.0).astype(jnp.bfloat16)
    # out (dropout = identity in eval mode)
    o = jnp.dot(h2, w3_ref[...], preferred_element_type=jnp.float32)
    o_ref[...] = (o + b3_ref[...]).astype(o_ref.dtype)


def prepare_params(params):
    """One-time conversion of master f32 params to the kernel's layout:
    bf16 weights (MXU inputs), f32 biases, W3/b3 zero-padded 10 -> 128."""
    w1, b1, w2, b2, w3, b3 = params
    w1_p = w1.astype(jnp.bfloat16)
    w2_p = w2.astype(jnp.bfloat16)
    w3_p = jnp.pad(w3, ((0, 0), (0, OUT_PAD - OUT_DIM))).astype(jnp.bfloat16)
    b1_p = b1.reshape(1, H1).astype(jnp.float32)
    b2_p = b2.reshape(1, H2).astype(jnp.float32)
    b3_p = jnp.pad(b3.reshape(1, OUT_DIM),
                   ((0, 0), (0, OUT_PAD - OUT_DIM))).astype(jnp.float32)
    return (w1_p, b1_p, w2_p, b2_p, w3_p, b3_p)


def fnet_forward(x, prepared_params, *, tile_b_max=1024):
    """x: (B, 1, 28, 28) or (B, 784). prepared_params from prepare_params().
    Returns (B, 10) float32 logits."""
    w1_p, b1_p, w2_p, b2_p, w3_p, b3_p = prepared_params
    x2d = x.reshape(-1, IN_DIM)
    B = x2d.shape[0]

    # Adaptive batch tile: big tiles amortize the ~0.35us/step pipeline
    # overhead; the ceil(B/2) clamp keeps >= 2 grid steps when possible so
    # v7x's two TensorCores both get work (dimension_semantics=parallel).
    tile_b = min(tile_b_max, max(128, _round_up(pl.cdiv(B, 2), 128)))
    grid_b = pl.cdiv(B, tile_b)
    B_pad = grid_b * tile_b
    if B_pad != B:
        # Only materialized when B is not already tile-aligned.
        x2d = jnp.pad(x2d, ((0, B_pad - B), (0, 0)))

    x_bytes = B_pad * IN_DIM * x2d.dtype.itemsize
    w_bytes = (IN_DIM * H1 + H1 * H2 + H2 * OUT_PAD) * 2      # bf16 weights
    b_bytes = (H1 + H2 + OUT_PAD) * 4                         # f32 biases
    o_bytes = B_pad * OUT_PAD * 2                             # bf16 output
    flops = 2 * B_pad * (IN_DIM * H1 + H1 * H2 + H2 * OUT_PAD)

    out = pl.pallas_call(
        fnet_kernel,
        out_shape=jax.ShapeDtypeStruct((B_pad, OUT_PAD), jnp.bfloat16),
        grid_spec=pltpu.PrefetchScalarGridSpec(
            num_scalar_prefetch=0,
            grid=(grid_b,),
            in_specs=[
                # x tile: full K (784 == full last dim, so no 128-divisibility
                # requirement); native dtype, cast to bf16 in-kernel.
                pl.BlockSpec((tile_b, IN_DIM), lambda i: (i, 0)),
                pl.BlockSpec((IN_DIM, H1), lambda i: (0, 0)),    # W1 (whole)
                pl.BlockSpec((1, H1), lambda i: (0, 0)),         # b1
                pl.BlockSpec((H1, H2), lambda i: (0, 0)),        # W2
                pl.BlockSpec((1, H2), lambda i: (0, 0)),         # b2
                pl.BlockSpec((H2, OUT_PAD), lambda i: (0, 0)),   # W3
                pl.BlockSpec((1, OUT_PAD), lambda i: (0, 0)),    # b3
            ],
            out_specs=pl.BlockSpec((tile_b, OUT_PAD), lambda i: (i, 0)),
        ),
        compiler_params=pltpu.CompilerParams(
            dimension_semantics=("parallel",),
            vmem_limit_bytes=32 * 1024 * 1024,
        ),
        cost_estimate=pl.CostEstimate(
            flops=flops,
            transcendentals=0,
            bytes_accessed=x_bytes + w_bytes + b_bytes + o_bytes),
    )(x2d, w1_p, b1_p, w2_p, b2_p, w3_p, b3_p)

    return out[:B, :OUT_DIM].astype(jnp.float32)


def init_params(key):
    """Deterministic synthetic params; shapes match nn.Linear layers
    (stored transposed: (in, out)), kept in f32 as the master copy."""
    k1, k2, k3, k4, k5, k6 = jax.random.split(key, 6)

    def lin(kw, kb, fan_in, fan_out):
        bound = 1.0 / jnp.sqrt(fan_in)
        w = jax.random.uniform(kw, (fan_in, fan_out), jnp.float32, -bound, bound)
        b = jax.random.uniform(kb, (1, fan_out), jnp.float32, -bound, bound)
        return w, b

    w1, b1 = lin(k1, k2, IN_DIM, H1)
    w2, b2 = lin(k3, k4, H1, H2)
    w3, b3 = lin(k5, k6, H2, OUT_DIM)
    return (w1, b1, w2, b2, w3, b3)


def reference_forward(x, params):
    w1, b1, w2, b2, w3, b3 = params
    x2d = x.reshape(-1, IN_DIM).astype(jnp.float32)
    h1 = jnp.maximum(x2d @ w1 + b1, 0.0)
    h2 = jnp.maximum(h1 @ w2 + b2, 0.0)
    return h2 @ w3 + b3


if __name__ == "__main__":
    key = jax.random.PRNGKey(0)
    kx, kp = jax.random.split(key)

    # Small input consistent with the forward's x.view(-1, 28*28): NCHW images.
    x = jax.random.normal(kx, (8, 1, 28, 28), dtype=jnp.float32)
    params = init_params(kp)
    prepared = prepare_params(params)   # one-time weight conversion/padding

    out = fnet_forward(x, prepared)
    out = jax.block_until_ready(out)

    ref = reference_forward(x, params)
    assert out.shape == (8, 10)
    # bf16 MXU inputs / bf16 output store -> looser tolerance vs f32 reference.
    assert jnp.allclose(out, ref, atol=5e-2, rtol=5e-2), "mismatch vs JAX reference"

    print("KERNEL_OK")
</pallas_src>

<mosaic_0001>
module attributes {stable_mosaic.version = 11 : i64} {
  func.func @fnet_kernel(%arg0: i32, %arg1: memref<128x784xf32, #tpu.memory_space<vmem>>, %arg2: memref<784x512xbf16, #tpu.memory_space<vmem>>, %arg3: memref<1x512xf32, #tpu.memory_space<vmem>>, %arg4: memref<512x256xbf16, #tpu.memory_space<vmem>>, %arg5: memref<1x256xf32, #tpu.memory_space<vmem>>, %arg6: memref<256x128xbf16, #tpu.memory_space<vmem>>, %arg7: memref<1x128xf32, #tpu.memory_space<vmem>>, %arg8: memref<128x128xbf16, #tpu.memory_space<vmem>>) attributes {dimension_semantics = [#tpu.dimension_semantics<parallel>], iteration_bounds = array<i64: 1>, scalar_prefetch = 0 : i64, scratch_operands = 0 : i64, tpu.core_type = #tpu.core_type<tc>, window_params = [{transform_indices = @transform_0, window_bounds = array<i64: 128, 784>}, {pipeline_mode = #tpu.pipeline_mode<synchronous>, transform_indices = @transform_1, window_bounds = array<i64: 784, 512>}, {pipeline_mode = #tpu.pipeline_mode<synchronous>, transform_indices = @transform_2, window_bounds = array<i64: 1, 512>}, {pipeline_mode = #tpu.pipeline_mode<synchronous>, transform_indices = @transform_3, window_bounds = array<i64: 512, 256>}, {pipeline_mode = #tpu.pipeline_mode<synchronous>, transform_indices = @transform_4, window_bounds = array<i64: 1, 256>}, {pipeline_mode = #tpu.pipeline_mode<synchronous>, transform_indices = @transform_5, window_bounds = array<i64: 256, 128>}, {pipeline_mode = #tpu.pipeline_mode<synchronous>, transform_indices = @transform_6, window_bounds = array<i64: 1, 128>}, {transform_indices = @transform_7, window_bounds = array<i64: 128, 128>}]} {
    %c0 = arith.constant 0 : index
    %c0_0 = arith.constant 0 : index
    %0 = vector.load %arg1[%c0, %c0_0] : memref<128x784xf32, #tpu.memory_space<vmem>>, vector<128x784xf32>
    %1 = arith.truncf %0 : vector<128x784xf32> to vector<128x784xbf16>
    %c0_1 = arith.constant 0 : index
    %c0_2 = arith.constant 0 : index
    %2 = vector.load %arg2[%c0_1, %c0_2] : memref<784x512xbf16, #tpu.memory_space<vmem>>, vector<784x512xbf16>
    %cst = arith.constant dense<0.000000e+00> : vector<128x512xf32>
    %3 = tpu.matmul %1, %2, %cst {dimension_numbers = #tpu.dot_dimension_numbers<[1], [0], [0], [1], [0, 0, 1, 1], [], []>} : vector<128x784xbf16>, vector<784x512xbf16>, vector<128x512xf32> -> vector<128x512xf32>
    %c0_3 = arith.constant 0 : index
    %c0_4 = arith.constant 0 : index
    %4 = vector.load %arg3[%c0_3, %c0_4] : memref<1x512xf32, #tpu.memory_space<vmem>>, vector<1x512xf32>
    %5 = vector.broadcast %4 : vector<1x512xf32> to vector<128x512xf32>
    %6 = arith.addf %3, %5 : vector<128x512xf32>
    %cst_5 = arith.constant 0.000000e+00 : f32
    %7 = vector.broadcast %cst_5 : f32 to vector<128x512xf32>
    %8 = arith.maximumf %6, %7 : vector<128x512xf32>
    %9 = arith.truncf %8 : vector<128x512xf32> to vector<128x512xbf16>
    %c0_6 = arith.constant 0 : index
    %c0_7 = arith.constant 0 : index
    %10 = vector.load %arg4[%c0_6, %c0_7] : memref<512x256xbf16, #tpu.memory_space<vmem>>, vector<512x256xbf16>
    %cst_8 = arith.constant dense<0.000000e+00> : vector<128x256xf32>
    %11 = tpu.matmul %9, %10, %cst_8 {dimension_numbers = #tpu.dot_dimension_numbers<[1], [0], [0], [1], [0, 0, 1, 1], [], []>} : vector<128x512xbf16>, vector<512x256xbf16>, vector<128x256xf32> -> vector<128x256xf32>
    %c0_9 = arith.constant 0 : index
    %c0_10 = arith.constant 0 : index
    %12 = vector.load %arg5[%c0_9, %c0_10] : memref<1x256xf32, #tpu.memory_space<vmem>>, vector<1x256xf32>
    %13 = vector.broadcast %12 : vector<1x256xf32> to vector<128x256xf32>
    %14 = arith.addf %11, %13 : vector<128x256xf32>
    %cst_11 = arith.constant 0.000000e+00 : f32
    %15 = vector.broadcast %cst_11 : f32 to vector<128x256xf32>
    %16 = arith.maximumf %14, %15 : vector<128x256xf32>
    %17 = arith.truncf %16 : vector<128x256xf32> to vector<128x256xbf16>
    %c0_12 = arith.constant 0 : index
    %c0_13 = arith.constant 0 : index
    %18 = vector.load %arg6[%c0_12, %c0_13] : memref<256x128xbf16, #tpu.memory_space<vmem>>, vector<256x128xbf16>
    %cst_14 = arith.constant dense<0.000000e+00> : vector<128x128xf32>
    %19 = tpu.matmul %17, %18, %cst_14 {dimension_numbers = #tpu.dot_dimension_numbers<[1], [0], [0], [1], [0, 0, 1, 1], [], []>} : vector<128x256xbf16>, vector<256x128xbf16>, vector<128x128xf32> -> vector<128x128xf32>
    %c0_15 = arith.constant 0 : index
    %c0_16 = arith.constant 0 : index
    %20 = vector.load %arg7[%c0_15, %c0_16] : memref<1x128xf32, #tpu.memory_space<vmem>>, vector<1x128xf32>
    %21 = vector.broadcast %20 : vector<1x128xf32> to vector<128x128xf32>
    %22 = arith.addf %19, %21 : vector<128x128xf32>
    %23 = arith.truncf %22 : vector<128x128xf32> to vector<128x128xbf16>
    %c0_17 = arith.constant 0 : index
    %c0_18 = arith.constant 0 : index
    %24 = vector.load %arg8[%c0_17, %c0_18] : memref<128x128xbf16, #tpu.memory_space<vmem>>, vector<128x128xbf16>
    tpu.vector_store %arg8[%c0_17, %c0_18], %23 {strides = array<i32>} : memref<128x128xbf16, #tpu.memory_space<vmem>>, vector<128x128xbf16>,
    return
  }
  func.func @transform_0(%arg0: i32) -> (i32, i32) {
    %c0_i32 = arith.constant 0 : i32
    %c0_i32_0 = arith.constant 0 : i32
    return %arg0, %c0_i32 : i32, i32
  }
  func.func @transform_1(%arg0: i32) -> (i32, i32) {
    %c0_i32 = arith.constant 0 : i32
    %c0_i32_0 = arith.constant 0 : i32
    %c0_i32_1 = arith.constant 0 : i32
    return %c0_i32, %c0_i32_0 : i32, i32
  }
  func.func @transform_2(%arg0: i32) -> (i32, i32) {
    %c0_i32 = arith.constant 0 : i32
    %c0_i32_0 = arith.constant 0 : i32
    %c0_i32_1 = arith.constant 0 : i32
    return %c0_i32, %c0_i32_0 : i32, i32
  }
  func.func @transform_3(%arg0: i32) -> (i32, i32) {
    %c0_i32 = arith.constant 0 : i32
    %c0_i32_0 = arith.constant 0 : i32
    %c0_i32_1 = arith.constant 0 : i32
    return %c0_i32, %c0_i32_0 : i32, i32
  }
  func.func @transform_4(%arg0: i32) -> (i32, i32) {
    %c0_i32 = arith.constant 0 : i32
    %c0_i32_0 = arith.constant 0 : i32
    %c0_i32_1 = arith.constant 0 : i32
    return %c0_i32, %c0_i32_0 : i32, i32
  }
  func.func @transform_5(%arg0: i32) -> (i32, i32) {
    %c0_i32 = arith.constant 0 : i32
    %c0_i32_0 = arith.constant 0 : i32
    %c0_i32_1 = arith.constant 0 : i32
    return %c0_i32, %c0_i32_0 : i32, i32
  }
  func.func @transform_6(%arg0: i32) -> (i32, i32) {
    %c0_i32 = arith.constant 0 : i32
    %c0_i32_0 = arith.constant 0 : i32
    %c0_i32_1 = arith.constant 0 : i32
    return %c0_i32, %c0_i32_0 : i32, i32
  }
  func.func @transform_7(%arg0: i32) -> (i32, i32) {
    %c0_i32 = arith.constant 0 : i32
    %c0_i32_0 = arith.constant 0 : i32
    return %arg0, %c0_i32 : i32, i32
  }
}

</mosaic_0001>

<bundles_post_ra>
// kernel: tpu_custom_call.1
= control target key start
LH: loop header
LB: loop body
LE: loop exit
PB: predicated region body
PF: predicated region fallthrough
CT: control target
= control target key end

     0   :  { %12 = vsyncpa [#allocation3], 0  ;;  %s6099_s0 = inlined_call_operand.vmem [shape: f32[128,784], index: 0, kind: input, shape index: {}]   ;;  %s6100_s1 = inlined_call_operand.vmem [shape: bf16[784,512], index: 1, kind: input, shape index: {}]   ;;  %s6101_s2 = inlined_call_operand.hbm [shape: f32[1,512], index: 2, kind: input, shape index: {}]   ;;  %s6102_s3 = inlined_call_operand.hbm [shape: bf16[512,256], index: 3, kind: input, shape index: {}]   ;;  %s6103_s4 = inlined_call_operand.vmem [shape: f32[1,256], index: 4, kind: input, shape index: {}]   ;;  %s6104_s5 = inlined_call_operand.vmem [shape: bf16[256,128], index: 5, kind: input, shape index: {}]   ;;  %s6105_s6 = inlined_call_operand.hbm [shape: f32[1,128], index: 6, kind: input, shape index: {}]   ;;  %s6106_s7 = inlined_call_operand.hbm [shape: bf16[128,128], index: 7, kind: output, shape index: {}]  }
   0x1   :  { %13 = vsyncpa [#allocation6], 0 }
   0x2   :  { %14 = vsyncpa [#allocation4], 0  ;;  %s4721_s24 = smov [#allocation5]   ;;  %s4627_s28 = scalar_lea.hbm %s6102_s3, 8192 }
   0x3   :  { %s34_s25 = sshll.u32 %s4721_s24, 4  ;;  %p4628_p0 = scmp.ne.s32.totalorder %s6102_s3, %s4627_s28  ;;  %s35_s25 = int_to_ptr.vmem [resolvable:$true] %s34_s25 }
   0x4   :  { %p4631_p1 = scmp.lt.u32.totalorder %s4627_s28, %s6102_s3 }
   0x6   :  { %p4633_p2 = pnand %p4631_p1, %p4628_p0 }
   0x8   :  { %4636 = shalt.err (!%p4633_p2)
}
   0x9   :  { %s4637_s10 = scalar_lea.vmem %s35_s25, 8192  ;;  %p4642_p4 = scmp.lt.s32.totalorder %s35_s25, %s35_s25 }
   0xa   :  { %p4638_p3 = scmp.ne.s32.totalorder %s35_s25, %s4637_s10  ;;  %p4643_p5 = scmp.lt.s32.totalorder %s4637_s10, %s4637_s10 }
   0xc   :  { %p4644_p6 = por %p4643_p5, %p4642_p4 }
   0xe   :  { %p4645_p7 = pnand %p4644_p6, %p4638_p3 }
  0x10   :  { %4648 = shalt.err (!%p4645_p7)
}
  0x11   :  { %s4722_s11 = smov 128   ;;  %s4723_s12 = smov 8  }
  0x12   :  { %40 = dma.hbm_to_vmem [thread:$0]  %s6102_s3, 8192, %s35_s25, [#allocation6], %s4722_s11, %s4722_s11, %s4723_s12  }
  0x13   :  { %s4724_s15 = smov [#allocation2]   ;;  %s4725_s17 = smov [#allocation7]  }
  0x14   :  { %s25_s16 = sshll.u32 %s4724_s15, 4  ;;  %s51_s18 = sshll.u32 %s4725_s17, 4  ;;  %s26_s16 = int_to_ptr.vmem [resolvable:$true] %s25_s16  ;;  %s52_s18 = int_to_ptr.vmem [resolvable:$true] %s51_s18 }
  0x15   :  { %s4649_s21 = scalar_lea.hbm %s6101_s2, 64 }
  0x16   :  { %p4650_p8 = scmp.ne.s32.totalorder %s6101_s2, %s4649_s21  ;;  %p4653_p9 = scmp.lt.u32.totalorder %s4649_s21, %s6101_s2 }
  0x18   :  { %p4655_p10 = pnand %p4653_p9, %p4650_p8 }
  0x1a   :  { %4658 = shalt.err (!%p4655_p10)
}
  0x1b   :  { %s4659_s3 = scalar_lea.vmem %s26_s16, 64  ;;  %p4664_p12 = scmp.lt.s32.totalorder %s26_s16, %s26_s16 }
  0x1c   :  { %p4660_p11 = scmp.ne.s32.totalorder %s26_s16, %s4659_s3  ;;  %p4665_p13 = scmp.lt.s32.totalorder %s4659_s3, %s4659_s3 }
  0x1e   :  { %p4666_p0 = por %p4665_p13, %p4664_p12 }
  0x20   :  { %p4667_p1 = pnand %p4666_p0, %p4660_p11 }
  0x22   :  { %4670 = shalt.err (!%p4667_p1)
}
  0x23   :  { %28 = dma.hbm_to_vmem [thread:$0]  %s6101_s2, 64, %s26_s16, [#allocation3]  }
  0x24   :  { %s4671_s30 = scalar_lea.hbm %s6105_s6, 16 }
  0x25   :  { %p4672_p2 = scmp.ne.s32.totalorder %s6105_s6, %s4671_s30  ;;  %p4675_p3 = scmp.lt.u32.totalorder %s4671_s30, %s6105_s6 }
  0x27   :  { %p4677_p4 = pnand %p4675_p3, %p4672_p2 }
  0x29   :  { %4680 = shalt.err (!%p4677_p4)
}
  0x2a   :  { %s4681_s12 = scalar_lea.vmem %s52_s18, 16  ;;  %s4685_s13 = scalar_lea.vmem %s52_s18, 32 }
  0x2b   :  { %p4682_p5 = scmp.ne.s32.totalorder %s52_s18, %s4681_s12  ;;  %p4686_p6 = scmp.lt.s32.totalorder %s52_s18, %s52_s18 }
  0x2c   :  { %p4687_p7 = scmp.lt.s32.totalorder %s4685_s13, %s4681_s12 }
  0x2e   :  { %p4688_p8 = por %p4687_p7, %p4686_p6 }
  0x30   :  { %p4689_p9 = pnand %p4688_p8, %p4682_p5 }
  0x32   :  { %4692 = shalt.err (!%p4689_p9)
}
  0x33   :  { %54 = dma.hbm_to_vmem [thread:$0]  %s6105_s6, 16, %s52_s18, [#allocation6]  }
  0x34   :  { %4715 = dma.done.wait [#allocation3], 64  }
  0x35   :  { %4716 = vsyncadd [#allocation3], 4294967232 }
  0x36   :  { %4717 = dma.done.wait [#allocation6], 8208  }
  0x37   :  { %4718 = vsyncadd [#allocation6], 4294959088  ;;  %v4726_v0 = vmov 0   ;;  %v4221_v1 = vld [vmem:[%s6100_s1 + $0x4] ss:$16 sps:$4 sm:$0xff]   ;;  %v78_v7 = vld [vmem:[%s6099_s0 + $0x68] sm:$0xff] }
  0x38   :  { %1827 = vmatprep.mubr.bf16.mxu1 %v4726_v0  ;;  %v4223_v2 = vld [vmem:[%s6100_s1 + $0x604] ss:$16 sps:$4 sm:$0xff]   ;;  %1456 = vmatprep.subr.bf16.mxu0 %v4221_v1  ;;  %v4225_v3 = vld [vmem:[%s6100_s1] ss:$16 sps:$4 sm:$0xff]   ;;  %vm1431_vm0 = vcmask 130048   ;;  %v92_v18 = vld [vmem:[%s6099_s0 + $0xd8] sm:$0xff] }
  0x39   :  { %v4226_v4 = vld [vmem:[%s6100_s1 + $0x600] ss:$16 sps:$4 sm:$0xff]   ;;  %1795 = vmatprep.subr.bf16.mxu1 %v4223_v2  ;;  %v4227_v5 = vld [vmem:[%s6100_s1 + $0x24] ss:$16 sps:$4 sm:$0xff]   ;;  %1457 = vmatpush1.bf16.msra.mxu0 %v4225_v3  ;;  %v4229_v9 = vld [vmem:[%s6100_s1 + $0x8] ss:$16 sps:$4 sm:$0xff]  }
  0x3a   :  { %v71_v6 = vld [vmem:[%s6099_s0 + $0x30] sm:$0xff]  ;;  %1796 = vmatpush1.bf16.msra.mxu1 %v4226_v4  ;;  %1458 = vmatprep.subr.bf16.mxu0 %v4227_v5  ;;  %v4231_v10 = vld [vmem:[%s6100_s1 + $0xc] ss:$16 sps:$4 sm:$0xff]   ;;  %v4235_v13 = vld [vmem:[%s6100_s1 + $0x28] ss:$16 sps:$4 sm:$0xff]  }
  0x3b   :  { %v4828_v8 = vpack.c.bf16 %v78_v7, %v71_v6  ;;  %v4232_v11 = vld [vmem:[%s6100_s1 + $0x20] ss:$16 sps:$4 sm:$0xff]   ;;  %v4233_v12 = vld [vmem:[%s6100_s1 + $0x44] ss:$16 sps:$4 sm:$0xff]   ;;  %1908 = vmatprep.subr.bf16.mxu1 %v4231_v10  ;;  %v4237_v14 = vld [vmem:[%s6100_s1 + $0x2c] ss:$16 sps:$4 sm:$0xff]  }
  0x3c   :  { %v4238_v15 = vld [vmem:[%s6100_s1 + $0x40] ss:$16 sps:$4 sm:$0xff]   ;;  %v4239_v16 = vld [vmem:[%s6100_s1 + $0x64] ss:$16 sps:$4 sm:$0xff]   ;;  %v4241_v20 = vld [vmem:[%s6100_s1 + $0x48] ss:$16 sps:$4 sm:$0xff]  }
  0x3d   :  { %3652 = vmatmul.mubr.msk.bf16.vlgmr.msra.gmra.mrb[0].mxu1 %vm1431_vm0, %v4828_v8  ;;  %1459 = vmatpush1.bf16.msra.mxu0 %v4232_v11  ;;  %v85_v17 = vld [vmem:[%s6099_s0 + $0xa0] sm:$0xff]  ;;  %v4243_v21 = vld [vmem:[%s6100_s1 + $0x4c] ss:$16 sps:$4 sm:$0xff]   ;;  %v4247_v24 = vld [vmem:[%s6100_s1 + $0x68] ss:$16 sps:$4 sm:$0xff]  }
  0x3e   :  { %1909 = vmatpush1.bf16.msra.mxu1 %v4229_v9  ;;  %1460 = vmatprep.subr.bf16.mxu0 %v4233_v12  ;;  %v4863_v19 = vpack.c.bf16 %v92_v18, %v85_v17  ;;  %v4244_v22 = vld [vmem:[%s6100_s1 + $0x60] ss:$16 sps:$4 sm:$0xff]   ;;  %v4245_v23 = vld [vmem:[%s6100_s1 + $0x84] ss:$16 sps:$4 sm:$0xff]   ;;  %v4249_v25 = vld [vmem:[%s6100_s1 + $0x6c] ss:$16 sps:$4 sm:$0xff]  }
  0x3f   :  { %1837 = vmatprep.mubr.bf16.mxu1 %v4726_v0  ;;  %1910 = vmatprep.subr.bf16.mxu1 %v4237_v14  ;;  %v4250_v26 = vld [vmem:[%s6100_s1 + $0x80] ss:$16 sps:$4 sm:$0xff]   ;;  %v106_v28 = vld [vmem:[%s6099_s0 + $0x148] sm:$0xff]  ;;  %v4251_v29 = vld [vmem:[%s6100_s1 + $0xa4] ss:$16 sps:$4 sm:$0xff]  }
  0x40   :  { %v99_v27 = vld [vmem:[%s6099_s0 + $0x110] sm:$0xff]  ;;  %v4255_v30 = vld [vmem:[%s6100_s1 + $0x8c] ss:$16 sps:$4 sm:$0xff]   ;;  %v4253_v32 = vld [vmem:[%s6100_s1 + $0x88] ss:$16 sps:$4 sm:$0xff]  }
  0x41   :  { %1461 = vmatpush1.bf16.msra.mxu0 %v4238_v15  ;;  %v4901_v31 = vpack.c.bf16 %v106_v28, %v99_v27  ;;  %v4256_v33 = vld [vmem:[%s6100_s1 + $0xa0] ss:$16 sps:$4 sm:$0xff]   ;;  %v4257_v34 = vld [vmem:[%s6100_s1 + $0xc4] ss:$16 sps:$4 sm:$0xff]   ;;  %v4261_v35 = vld [vmem:[%s6100_s1 + $0xac] ss:$16 sps:$4 sm:$0xff]  }
  0x42   :  { %1911 = vmatpush1.bf16.msra.mxu1 %v4235_v13  ;;  %1462 = vmatprep.subr.bf16.mxu0 %v4239_v16  ;;  %v4259_v36 = vld [vmem:[%s6100_s1 + $0xa8] ss:$16 sps:$4 sm:$0xff]   ;;  %v4262_v37 = vld [vmem:[%s6100_s1 + $0xc0] ss:$16 sps:$4 sm:$0xff]   ;;  %v4263_v38 = vld [vmem:[%s6100_s1 + $0xe4] ss:$16 sps:$4 sm:$0xff]  }
  0x43   :  { %1912 = vmatprep.subr.bf16.mxu1 %v4243_v21  ;;  %v113_v39 = vld [vmem:[%s6099_s0 + $0x180] sm:$0xff]  ;;  %v120_v40 = vld [vmem:[%s6099_s0 + $0x1b8] sm:$0xff]  ;;  %v127_v49 = vld [vmem:[%s6099_s0 + $0x1f0] sm:$0xff] }
  0x44   :  { %v4267_v41 = vld [vmem:[%s6100_s1 + $0xcc] ss:$16 sps:$4 sm:$0xff]   ;;  %v4936_v42 = vpack.c.bf16 %v120_v40, %v113_v39  ;;  %v4265_v43 = vld [vmem:[%s6100_s1 + $0xc8] ss:$16 sps:$4 sm:$0xff]   ;;  %v4268_v44 = vld [vmem:[%s6100_s1 + $0xe0] ss:$16 sps:$4 sm:$0xff]  }
  0x45   :  { %3653 = vmatmul.mubr.msk.bf16.gmra.mrb[4].mxu1 %vm1431_vm0, %v4863_v19  ;;  %1463 = vmatpush1.bf16.msra.mxu0 %v4244_v22  ;;  %v4269_v45 = vld [vmem:[%s6100_s1 + $0x104] ss:$16 sps:$4 sm:$0xff]   ;;  %v4273_v46 = vld [vmem:[%s6100_s1 + $0xec] ss:$16 sps:$4 sm:$0xff]   ;;  %v4271_v47 = vld [vmem:[%s6100_s1 + $0xe8] ss:$16 sps:$4 sm:$0xff]  }
  0x46   :  { %1913 = vmatpush1.bf16.msra.mxu1 %v4241_v20  ;;  %1464 = vmatprep.subr.bf16.mxu0 %v4245_v23  ;;  %v4274_v48 = vld [vmem:[%s6100_s1 + $0x100] ss:$16 sps:$4 sm:$0xff]   ;;  %v134_v50 = vld [vmem:[%s6099_s0 + $0x228] sm:$0xff]  ;;  %v4275_v51 = vld [vmem:[%s6100_s1 + $0x124] ss:$16 sps:$4 sm:$0xff]  }
  0x47   :  { %1914 = vmatprep.subr.bf16.mxu1 %v4249_v25  ;;  %1847 = vmatprep.mubr.bf16.mxu1 %v4726_v0  ;;  %v4279_v52 = vld [vmem:[%s6100_s1 + $0x10c] ss:$16 sps:$4 sm:$0xff]   ;;  %v4971_v53 = vpack.c.bf16 %v134_v50, %v127_v49  ;;  %v4277_v54 = vld [vmem:[%s6100_s1 + $0x108] ss:$16 sps:$4 sm:$0xff]   ;;  %v4280_v55 = vld [vmem:[%s6100_s1 + $0x120] ss:$16 sps:$4 sm:$0xff]  }
  0x48   :  { %v4281_v56 = vld [vmem:[%s6100_s1 + $0x144] ss:$16 sps:$4 sm:$0xff]   ;;  %v4285_v57 = vld [vmem:[%s6100_s1 + $0x12c] ss:$16 sps:$4 sm:$0xff]   ;;  %v4283_v58 = vld [vmem:[%s6100_s1 + $0x128] ss:$16 sps:$4 sm:$0xff]  }
  0x49   :  { %1465 = vmatpush1.bf16.msra.mxu0 %v4250_v26  ;;  %v4286_v59 = vld [vmem:[%s6100_s1 + $0x140] ss:$16 sps:$4 sm:$0xff]   ;;  %v148_v61 = vld [vmem:[%s6099_s0 + $0x298] sm:$0xff]  ;;  %v4287_v62 = vld [vmem:[%s6100_s1 + $0x164] ss:$16 sps:$4 sm:$0xff]  }
  0x4a   :  { %1915 = vmatpush1.bf16.msra.mxu1 %v4247_v24  ;;  %1466 = vmatprep.subr.bf16.mxu0 %v4251_v29  ;;  %v141_v60 = vld [vmem:[%s6099_s0 + $0x260] sm:$0xff]  ;;  %v4291_v63 = vld [vmem:[%s6100_s1 + $0x14c] ss:$16 sps:$4 sm:$0xff]   ;;  %v4289_v2 = vld [vmem:[%s6100_s1 + $0x148] ss:$16 sps:$4 sm:$0xff]  }
  0x4b   :  { %1916 = vmatprep.subr.bf16.mxu1 %v4255_v30  ;;  %v5006_v1 = vpack.c.bf16 %v148_v61, %v141_v60  ;;  %v4292_v3 = vld [vmem:[%s6100_s1 + $0x160] ss:$16 sps:$4 sm:$0xff]   ;;  %v4293_v4 = vld [vmem:[%s6100_s1 + $0x184] ss:$16 sps:$4 sm:$0xff]   ;;  %v4297_v5 = vld [vmem:[%s6100_s1 + $0x16c] ss:$16 sps:$4 sm:$0xff]  }
  0x4c   :  { %v4295_v6 = vld [vmem:[%s6100_s1 + $0x168] ss:$16 sps:$4 sm:$0xff]   ;;  %v4298_v7 = vld [vmem:[%s6100_s1 + $0x180] ss:$16 sps:$4 sm:$0xff]   ;;  %v4299_v9 = vld [vmem:[%s6100_s1 + $0x1a4] ss:$16 sps:$4 sm:$0xff]  }
  0x4d   :  { %3654 = vmatmul.mubr.msk.bf16.gmra.mrb[8].mxu1 %vm1431_vm0, %v4901_v31  ;;  %1467 = vmatpush1.bf16.msra.mxu0 %v4256_v33  ;;  %v155_v10 = vld [vmem:[%s6099_s0 + $0x2d0] sm:$0xff]  ;;  %v162_v11 = vld [vmem:[%s6099_s0 + $0x308] sm:$0xff]  ;;  %v73_v13 = vld [vmem:[%s6099_s0 + $0x40] sm:$0xff] }
  0x4e   :  { %1917 = vmatpush1.bf16.msra.mxu1 %v4253_v32  ;;  %1468 = vmatprep.subr.bf16.mxu0 %v4257_v34  ;;  %v66_v12 = vld [vmem:[%s6099_s0 + $0x8] sm:$0xff]  ;;  %v5047_v16 = vpack.c.bf16 %v162_v11, %v155_v10  ;;  %v4304_v18 = vld [vmem:[%s6100_s1 + $0x1a0] ss:$16 sps:$4 sm:$0xff]   ;;  %v4305_v20 = vld [vmem:[%s6100_s1 + $0x1c4] ss:$16 sps:$4 sm:$0xff]  }
  0x4f   :  { %1918 = vmatprep.subr.bf16.mxu1 %v4261_v35  ;;  %1857 = vmatprep.mubr.bf16.mxu1 %v4726_v0  ;;  %v4303_v14 = vld [vmem:[%s6100_s1 + $0x18c] ss:$16 sps:$4 sm:$0xff]   ;;  %v178_v15 = vpack.c.bf16 %v73_v13, %v66_v12  ;;  %v4301_v17 = vld [vmem:[%s6100_s1 + $0x188] ss:$16 sps:$4 sm:$0xff]   ;;  %v4310_v23 = vld [vmem:[%s6100_s1 + $0x1c0] ss:$16 sps:$4 sm:$0xff]  }
  0x50   :  { %v4309_v21 = vld [vmem:[%s6100_s1 + $0x1ac] ss:$16 sps:$4 sm:$0xff]   ;;  %v4307_v22 = vld [vmem:[%s6100_s1 + $0x1a8] ss:$16 sps:$4 sm:$0xff]   ;;  %v4311_v24 = vld [vmem:[%s6100_s1 + $0x1e4] ss:$16 sps:$4 sm:$0xff]  }
  0x51   :  { %1469 = vmatpush1.bf16.msra.mxu0 %v4262_v37  ;;  %1488 = vmatprep.mubr.bf16.mxu0 %v178_v15  ;;  %v169_v25 = vld [vmem:[%s6099_s0 + $0x340] sm:$0xff]  ;;  %v176_v26 = vld [vmem:[%s6099_s0 + $0x378] sm:$0xff]  ;;  %v87_v40 = vld [vmem:[%s6099_s0 + $0xb0] sm:$0xff] }
  0x52   :  { %1919 = vmatpush1.bf16.msra.mxu1 %v4259_v36  ;;  %1470 = vmatprep.subr.bf16.mxu0 %v4263_v38  ;;  %v4315_v27 = vld [vmem:[%s6100_s1 + $0x1cc] ss:$16 sps:$4 sm:$0xff]   ;;  %v4313_v28 = vld [vmem:[%s6100_s1 + $0x1c8] ss:$16 sps:$4 sm:$0xff]   ;;  %v5085_v29 = vpack.c.bf16 %v176_v26, %v169_v25  ;;  %v4316_v30 = vld [vmem:[%s6100_s1 + $0x1e0] ss:$16 sps:$4 sm:$0xff]  }
  0x53   :  { %1920 = vmatprep.subr.bf16.mxu1 %v4267_v41  ;;  %v65_v32 = vld [vmem:[%s6099_s0] sm:$0xff]  ;;  %v72_v33 = vld [vmem:[%s6099_s0 + $0x38] sm:$0xff] }
  0x54   :  { %v4319_v34 = vld [vmem:[%s6100_s1 + $0x204] ss:$16 sps:$4 sm:$0xff]   ;;  %v4322_v35 = vld [vmem:[%s6100_s1 + $0x1ec] ss:$16 sps:$4 sm:$0xff]   ;;  %v4317_v36 = vld [vmem:[%s6100_s1 + $0x200] ss:$16 sps:$4 sm:$0xff]   ;;  %v177_v38 = vpack.c.bf16 %v72_v33, %v65_v32 }
  0x55   :  { %3655 = vmatmul.mubr.msk.bf16.gmra.mrb[12].mxu1 %vm1431_vm0, %v4936_v42  ;;  %1471 = vmatpush1.bf16.msra.mxu0 %v4268_v44  ;;  %v4320_v37 = vld [vmem:[%s6100_s1 + $0x1e8] ss:$16 sps:$4 sm:$0xff]   ;;  %v4325_v41 = vld [vmem:[%s6100_s1 + $0x224] ss:$16 sps:$4 sm:$0xff]   ;;  %v4334_v50 = vld [vmem:[%s6100_s1 + $0x22c] ss:$16 sps:$4 sm:$0xff]  }
  0x56   :  { %1921 = vmatpush1.bf16.msra.mxu1 %v4265_v43  ;;  %1472 = vmatprep.subr.bf16.mxu0 %v4269_v45  ;;  %v80_v39 = vld [vmem:[%s6099_s0 + $0x78] sm:$0xff]  ;;  %v4323_v45 = vld [vmem:[%s6100_s1 + $0x220] ss:$16 sps:$4 sm:$0xff]   ;;  %v4331_v49 = vld [vmem:[%s6100_s1 + $0x244] ss:$16 sps:$4 sm:$0xff]  }
  0x57   :  { %1922 = vmatprep.subr.bf16.mxu1 %v4273_v46  ;;  %1867 = vmatprep.mubr.bf16.mxu1 %v4726_v0  ;;  %v4328_v43 = vld [vmem:[%s6100_s1 + $0x20c] ss:$16 sps:$4 sm:$0xff]   ;;  %v185_v44 = vpack.c.bf16 %v87_v40, %v80_v39  ;;  %v4326_v46 = vld [vmem:[%s6100_s1 + $0x208] ss:$16 sps:$4 sm:$0xff]   ;;  %v4349_v10 = vld [vmem:[%s6100_s1 + $0x2a4] ss:$16 sps:$4 sm:$0xff]  }
  0x58   :  { %v4338_v61 = vld [vmem:[%s6100_s1 + $0x248] ss:$16 sps:$4 sm:$0xff]   ;;  %v4352_v11 = vld [vmem:[%s6100_s1 + $0x28c] ss:$16 sps:$4 sm:$0xff]   ;;  %v4347_v12 = vld [vmem:[%s6100_s1 + $0x2a0] ss:$16 sps:$4 sm:$0xff]  }
  0x59   :  { %1473 = vmatpush1.bf16.msra.mxu0 %v4274_v48  ;;  %v86_v48 = vld [vmem:[%s6099_s0 + $0xa8] sm:$0xff]  ;;  %v4361_v26 = vld [vmem:[%s6100_s1 + $0x2e4] ss:$16 sps:$4 sm:$0xff]   ;;  %v136_v40 = vld [vmem:[%s6099_s0 + $0x238] sm:$0xff] }
  0x5a   :  { %1923 = vmatpush1.bf16.msra.mxu1 %v4271_v47  ;;  %1474 = vmatprep.subr.bf16.mxu0 %v4275_v51  ;;  %v79_v47 = vld [vmem:[%s6099_s0 + $0x70] sm:$0xff]  ;;  %v4350_v13 = vld [vmem:[%s6100_s1 + $0x288] ss:$16 sps:$4 sm:$0xff]   ;;  %v121_v33 = vld [vmem:[%s6099_s0 + $0x1c0] sm:$0xff] }
  0x5b   :  { %1924 = vmatprep.subr.bf16.mxu1 %v4279_v52  ;;  %v4329_v51 = vld [vmem:[%s6100_s1 + $0x240] ss:$16 sps:$4 sm:$0xff]   ;;  %v4332_v52 = vld [vmem:[%s6100_s1 + $0x228] ss:$16 sps:$4 sm:$0xff]  }
  0x5c   :  { %v4356_v25 = vld [vmem:[%s6100_s1 + $0x2a8] ss:$16 sps:$4 sm:$0xff]  }
  0x5d   :  { %3656 = vmatmul.mubr.msk.bf16.gmra.mrb[16].mxu1 %vm1431_vm0, %v4971_v53  ;;  %1475 = vmatpush1.bf16.msra.mxu0 %v4280_v55  ;;  %v94_v55 = vld [vmem:[%s6099_s0 + $0xe8] sm:$0xff] }
  0x5e   :  { %1925 = vmatpush1.bf16.msra.mxu1 %v4277_v54  ;;  %1476 = vmatprep.subr.bf16.mxu0 %v4281_v56  ;;  %v184_v54 = vpack.c.bf16 %v86_v48, %v79_v47  ;;  %v101_v56 = vld [vmem:[%s6099_s0 + $0x120] sm:$0xff]  ;;  %v4368_v39 = vld [vmem:[%s6100_s1 + $0x2e8] ss:$16 sps:$4 sm:$0xff]   ;;  %v135_v48 = vld [vmem:[%s6099_s0 + $0x230] sm:$0xff] }
  0x5f   :  { %1926 = vmatprep.subr.bf16.mxu1 %v4285_v57  ;;  %1877 = vmatprep.mubr.bf16.mxu1 %v4726_v0  ;;  %v4337_v57 = vld [vmem:[%s6100_s1 + $0x264] ss:$16 sps:$4 sm:$0xff]   ;;  %v192_v60 = vpack.c.bf16 %v101_v56, %v94_v55  ;;  %v4374_v47 = vld [vmem:[%s6100_s1 + $0x308] ss:$16 sps:$4 sm:$0xff]  }
  0x60   :  { %v150_v56 = vld [vmem:[%s6099_s0 + $0x2a8] sm:$0xff] }
  0x61   :  { %1477 = vmatpush1.bf16.msra.mxu0 %v4286_v59  ;;  %v4335_v59 = vld [vmem:[%s6100_s1 + $0x260] ss:$16 sps:$4 sm:$0xff]  }
  0x62   :  { %1927 = vmatpush1.bf16.msra.mxu1 %v4283_v58  ;;  %1478 = vmatprep.subr.bf16.mxu0 %v4287_v62  ;;  %v4340_v58 = vld [vmem:[%s6100_s1 + $0x24c] ss:$16 sps:$4 sm:$0xff]   ;;  %v93_v62 = vld [vmem:[%s6099_s0 + $0xe0] sm:$0xff] }
  0x63   :  { %1928 = vmatprep.subr.bf16.mxu1 %v4291_v63  ;;  %v100_v63 = vld [vmem:[%s6099_s0 + $0x118] sm:$0xff] }
  0x65   :  { %3657 = vmatmul.mubr.msk.bf16.gmra.mrb[20].mxu1 %vm1431_vm0, %v5006_v1  ;;  %1479 = vmatpush1.bf16.msra.mxu0 %v4292_v3  ;;  %v4346_v3 = vld [vmem:[%s6100_s1 + $0x26c] ss:$16 sps:$4 sm:$0xff]  }
  0x66   :  { %1929 = vmatpush1.bf16.msra.mxu1 %v4289_v2  ;;  %1480 = vmatprep.subr.bf16.mxu0 %v4293_v4  ;;  %v4343_v2 = vld [vmem:[%s6100_s1 + $0x284] ss:$16 sps:$4 sm:$0xff]   ;;  %v4341_v4 = vld [vmem:[%s6100_s1 + $0x280] ss:$16 sps:$4 sm:$0xff]  }
  0x67   :  { %1930 = vmatprep.subr.bf16.mxu1 %v4297_v5  ;;  %1887 = vmatprep.mubr.bf16.mxu1 %v4726_v0  ;;  %v191_v5 = vpack.c.bf16 %v100_v63, %v93_v62  ;;  %v4386_v62 = vld [vmem:[%s6100_s1 + $0x348] ss:$16 sps:$4 sm:$0xff]   ;;  %v149_v63 = vld [vmem:[%s6099_s0 + $0x2a0] sm:$0xff] }
  0x69   :  { %1481 = vmatpush1.bf16.msra.mxu0 %v4298_v7  ;;  %v115_v7 = vld [vmem:[%s6099_s0 + $0x190] sm:$0xff] }
  0x6a   :  { %1931 = vmatpush1.bf16.msra.mxu1 %v4295_v6  ;;  %1482 = vmatprep.subr.bf16.mxu0 %v4299_v9  ;;  %v108_v6 = vld [vmem:[%s6099_s0 + $0x158] sm:$0xff] }
  0x6b   :  { %1932 = vmatprep.subr.bf16.mxu1 %v4303_v14  ;;  %v4344_v9 = vld [vmem:[%s6100_s1 + $0x268] ss:$16 sps:$4 sm:$0xff]   ;;  %v199_v14 = vpack.c.bf16 %v115_v7, %v108_v6 }
  0x6c   :  { %v4392_v6 = vld [vmem:[%s6100_s1 + $0x368] ss:$16 sps:$4 sm:$0xff]  }
  0x6d   :  { %3658 = vmatmul.mubr.msk.bf16.gmra.mrb[24].mxu1 %vm1431_vm0, %v5047_v16  ;;  %1483 = vmatpush1.bf16.msra.mxu0 %v4304_v18  ;;  %v4355_v18 = vld [vmem:[%s6100_s1 + $0x2c4] ss:$16 sps:$4 sm:$0xff]  }
  0x6e   :  { %1933 = vmatpush1.bf16.msra.mxu1 %v4301_v17  ;;  %1484 = vmatprep.subr.bf16.mxu0 %v4305_v20  ;;  %v114_v17 = vld [vmem:[%s6099_s0 + $0x188] sm:$0xff] }
  0x6f   :  { %1934 = vmatprep.subr.bf16.mxu1 %v4309_v21  ;;  %1897 = vmatprep.mubr.bf16.mxu1 %v4726_v0  ;;  %v4358_v20 = vld [vmem:[%s6100_s1 + $0x2ac] ss:$16 sps:$4 sm:$0xff]  }
  0x71   :  { %1485 = vmatpush1.bf16.msra.mxu0 %v4310_v23  ;;  %v129_v23 = vld [vmem:[%s6099_s0 + $0x200] sm:$0xff] }
  0x72   :  { %1935 = vmatpush1.bf16.msra.mxu1 %v4307_v22  ;;  %1486 = vmatprep.subr.bf16.mxu0 %v4311_v24  ;;  %v122_v22 = vld [vmem:[%s6099_s0 + $0x1c8] sm:$0xff]  ;;  %v4353_v24 = vld [vmem:[%s6100_s1 + $0x2c0] ss:$16 sps:$4 sm:$0xff]  }
  0x73   :  { %1936 = vmatprep.subr.bf16.mxu1 %v4315_v27  ;;  %v4364_v27 = vld [vmem:[%s6100_s1 + $0x2cc] ss:$16 sps:$4 sm:$0xff]   ;;  %v206_v32 = vpack.c.bf16 %v129_v23, %v122_v22  ;;  %v4401_v22 = vld [vmem:[%s6100_s1 + $0x3c0] ss:$16 sps:$4 sm:$0xff]  }
  0x75   :  { %3659 = vmatmul.mubr.msk.bf16.gmra.mrb[28].mxu1 %vm1431_vm0, %v5085_v29  ;;  %1487 = vmatpush1.bf16.msra.mxu0 %v4316_v30  ;;  %v4362_v30 = vld [vmem:[%s6100_s1 + $0x2c8] ss:$16 sps:$4 sm:$0xff]  }
  0x76   :  { %1937 = vmatpush1.bf16.msra.mxu1 %v4313_v28  ;;  %1569 = vmatprep.subr.bf16.mxu0 %v4319_v34  ;;  %v4359_v28 = vld [vmem:[%s6100_s1 + $0x2e0] ss:$16 sps:$4 sm:$0xff]   ;;  %v128_v34 = vld [vmem:[%s6099_s0 + $0x1f8] sm:$0xff] }
  0x77   :  { %1938 = vmatprep.subr.bf16.mxu1 %v4322_v35  ;;  %1940 = vmatprep.mubr.bf16.mxu1 %v178_v15  ;;  %v107_v15 = vld [vmem:[%s6099_s0 + $0x150] sm:$0xff] }
  0x78   :  { %1489 = vmatmul.mubr.bf16.vlgmr.msra.gmra.mrb[0].mxu0 %v177_v38  ;;  %v198_v21 = vpack.c.bf16 %v114_v17, %v107_v15  ;;  %v4367_v35 = vld [vmem:[%s6100_s1 + $0x304] ss:$16 sps:$4 sm:$0xff]   ;;  %v4398_v15 = vld [vmem:[%s6100_s1 + $0x388] ss:$16 sps:$4 sm:$0xff]  }
  0x79   :  { %1570 = vmatpush1.bf16.msra.mxu0 %v4317_v36  ;;  %1498 = vmatprep.mubr.bf16.mxu0 %v185_v44  ;;  %v4370_v36 = vld [vmem:[%s6100_s1 + $0x2ec] ss:$16 sps:$4 sm:$0xff]   ;;  %v163_v17 = vld [vmem:[%s6099_s0 + $0x310] sm:$0xff] }
  0x7a   :  { %1939 = vmatpush1.bf16.msra.mxu1 %v4320_v37  ;;  %1571 = vmatprep.subr.bf16.mxu0 %v4325_v41  ;;  %v4365_v37 = vld [vmem:[%s6100_s1 + $0x300] ss:$16 sps:$4 sm:$0xff]  }
  0x7b   :  { %2021 = vmatprep.subr.bf16.mxu1 %v4328_v43  ;;  %v143_v41 = vld [vmem:[%s6099_s0 + $0x270] sm:$0xff] }
  0x7c   :  { %v4373_v43 = vld [vmem:[%s6100_s1 + $0x324] ss:$16 sps:$4 sm:$0xff]  }
  0x7d   :  { %1941 = vmatmul.mubr.bf16.vlgmr.msra.gmra.mrb[32].mxu1 %v177_v38  ;;  %1572 = vmatpush1.bf16.msra.mxu0 %v4323_v45  ;;  %v205_v38 = vpack.c.bf16 %v128_v34, %v121_v33  ;;  %v4371_v45 = vld [vmem:[%s6100_s1 + $0x320] ss:$16 sps:$4 sm:$0xff]  }
  0x7e   :  { %2022 = vmatpush1.bf16.msra.mxu1 %v4326_v46  ;;  %1573 = vmatprep.subr.bf16.mxu0 %v4331_v49  ;;  %v213_v46 = vpack.c.bf16 %v143_v41, %v136_v40  ;;  %v142_v49 = vld [vmem:[%s6099_s0 + $0x268] sm:$0xff]  ;;  %v67_v34 = vld [vmem:[%s6099_s0 + $0x10] sm:$0xff]  ;;  %v89_v40 = vld [vmem:[%s6099_s0 + $0xc0] sm:$0xff] }
  0x7f   :  { %2023 = vmatprep.subr.bf16.mxu1 %v4334_v50  ;;  %1950 = vmatprep.mubr.bf16.mxu1 %v185_v44  ;;  %v4376_v44 = vld [vmem:[%s6100_s1 + $0x30c] ss:$16 sps:$4 sm:$0xff]   ;;  %v4379_v50 = vld [vmem:[%s6100_s1 + $0x344] ss:$16 sps:$4 sm:$0xff]   ;;  %v212_v55 = vpack.c.bf16 %v142_v49, %v135_v48  ;;  %v4413_v41 = vld [vmem:[%s6100_s1 + $0x400] ss:$16 sps:$4 sm:$0xff]  }
  0x80   :  { %1499 = vmatmul.mubr.bf16.gmra.mrb[4].mxu0 %v184_v54  ;;  %v81_v49 = vld [vmem:[%s6099_s0 + $0x80] sm:$0xff] }
  0x81   :  { %1574 = vmatpush1.bf16.msra.mxu0 %v4329_v51  ;;  %1508 = vmatprep.mubr.bf16.mxu0 %v192_v60  ;;  %v4382_v51 = vld [vmem:[%s6100_s1 + $0x32c] ss:$16 sps:$4 sm:$0xff]  }
  0x82   :  { %2024 = vmatpush1.bf16.msra.mxu1 %v4332_v52  ;;  %1575 = vmatprep.subr.bf16.mxu0 %v4337_v57  ;;  %v4377_v52 = vld [vmem:[%s6100_s1 + $0x340] ss:$16 sps:$4 sm:$0xff]  }
  0x83   :  { %2025 = vmatprep.subr.bf16.mxu1 %v4340_v58  ;;  %v157_v57 = vld [vmem:[%s6099_s0 + $0x2e0] sm:$0xff] }
  0x84   :  { %v4385_v58 = vld [vmem:[%s6100_s1 + $0x364] ss:$16 sps:$4 sm:$0xff]  }
  0x85   :  { %1951 = vmatmul.mubr.bf16.gmra.mrb[36].mxu1 %v184_v54  ;;  %1576 = vmatpush1.bf16.msra.mxu0 %v4335_v59  ;;  %v4380_v54 = vld [vmem:[%s6100_s1 + $0x328] ss:$16 sps:$4 sm:$0xff]   ;;  %v4388_v59 = vld [vmem:[%s6100_s1 + $0x34c] ss:$16 sps:$4 sm:$0xff]  }
  0x86   :  { %2026 = vmatpush1.bf16.msra.mxu1 %v4338_v61  ;;  %1577 = vmatprep.subr.bf16.mxu0 %v4343_v2  ;;  %v4383_v61 = vld [vmem:[%s6100_s1 + $0x360] ss:$16 sps:$4 sm:$0xff]   ;;  %v156_v2 = vld [vmem:[%s6099_s0 + $0x2d8] sm:$0xff] }
  0x87   :  { %2027 = vmatprep.subr.bf16.mxu1 %v4346_v3  ;;  %1960 = vmatprep.mubr.bf16.mxu1 %v192_v60  ;;  %v220_v60 = vpack.c.bf16 %v157_v57, %v150_v56  ;;  %v4391_v3 = vld [vmem:[%s6100_s1 + $0x384] ss:$16 sps:$4 sm:$0xff]   ;;  %v219_v7 = vpack.c.bf16 %v156_v2, %v149_v63  ;;  %v4428_v56 = vld [vmem:[%s6100_s1 + $0x428] ss:$16 sps:$4 sm:$0xff]  }
  0x88   :  { %1509 = vmatmul.mubr.bf16.gmra.mrb[8].mxu0 %v191_v5  ;;  %v96_v57 = vld [vmem:[%s6099_s0 + $0xf8] sm:$0xff]  ;;  %v95_v2 = vld [vmem:[%s6099_s0 + $0xf0] sm:$0xff] }
  0x89   :  { %1578 = vmatpush1.bf16.msra.mxu0 %v4341_v4  ;;  %1518 = vmatprep.mubr.bf16.mxu0 %v199_v14  ;;  %v4394_v4 = vld [vmem:[%s6100_s1 + $0x36c] ss:$16 sps:$4 sm:$0xff]   ;;  %v4434_v63 = vld [vmem:[%s6100_s1 + $0x448] ss:$16 sps:$4 sm:$0xff]  }
  0x8a   :  { %2028 = vmatpush1.bf16.msra.mxu1 %v4344_v9  ;;  %1579 = vmatprep.subr.bf16.mxu0 %v4349_v10  ;;  %v164_v9 = vld [vmem:[%s6099_s0 + $0x318] sm:$0xff]  ;;  %v171_v10 = vld [vmem:[%s6099_s0 + $0x350] sm:$0xff] }
  0x8b   :  { %2029 = vmatprep.subr.bf16.mxu1 %v4352_v11  ;;  %v4397_v11 = vld [vmem:[%s6100_s1 + $0x3a4] ss:$16 sps:$4 sm:$0xff]  }
  0x8d   :  { %1961 = vmatmul.mubr.bf16.gmra.mrb[40].mxu1 %v191_v5  ;;  %1580 = vmatpush1.bf16.msra.mxu0 %v4347_v12  ;;  %v4389_v5 = vld [vmem:[%s6100_s1 + $0x380] ss:$16 sps:$4 sm:$0xff]   ;;  %v4400_v12 = vld [vmem:[%s6100_s1 + $0x38c] ss:$16 sps:$4 sm:$0xff]  }
  0x8e   :  { %2030 = vmatpush1.bf16.msra.mxu1 %v4350_v13  ;;  %1581 = vmatprep.subr.bf16.mxu0 %v4355_v18  ;;  %v4395_v13 = vld [vmem:[%s6100_s1 + $0x3a0] ss:$16 sps:$4 sm:$0xff]   ;;  %v170_v18 = vld [vmem:[%s6099_s0 + $0x348] sm:$0xff] }
  0x8f   :  { %2031 = vmatprep.subr.bf16.mxu1 %v4358_v20  ;;  %1970 = vmatprep.mubr.bf16.mxu1 %v199_v14  ;;  %v227_v14 = vpack.c.bf16 %v171_v10, %v164_v9  ;;  %v4403_v20 = vld [vmem:[%s6100_s1 + $0x3c4] ss:$16 sps:$4 sm:$0xff]   ;;  %v226_v23 = vpack.c.bf16 %v170_v18, %v163_v17  ;;  %v110_v10 = vld [vmem:[%s6099_s0 + $0x168] sm:$0xff] }
  0x90   :  { %1519 = vmatmul.mubr.bf16.gmra.mrb[12].mxu0 %v198_v21  ;;  %v4446_v17 = vld [vmem:[%s6100_s1 + $0x488] ss:$16 sps:$4 sm:$0xff]   ;;  %v109_v18 = vld [vmem:[%s6099_s0 + $0x160] sm:$0xff] }
  0x91   :  { %1582 = vmatpush1.bf16.msra.mxu0 %v4353_v24  ;;  %1528 = vmatprep.mubr.bf16.mxu0 %v206_v32  ;;  %v68_v24 = vld [vmem:[%s6099_s0 + $0x18] sm:$0xff] }
  0x92   :  { %2032 = vmatpush1.bf16.msra.mxu1 %v4356_v25  ;;  %1583 = vmatprep.subr.bf16.mxu0 %v4361_v26  ;;  %v75_v25 = vld [vmem:[%s6099_s0 + $0x50] sm:$0xff]  ;;  %v4404_v26 = vld [vmem:[%s6100_s1 + $0x3a8] ss:$16 sps:$4 sm:$0xff]  }
  0x93   :  { %2033 = vmatprep.subr.bf16.mxu1 %v4364_v27  ;;  %v4409_v27 = vld [vmem:[%s6100_s1 + $0x3e4] ss:$16 sps:$4 sm:$0xff]   ;;  %v180_v33 = vpack.c.bf16 %v75_v25, %v68_v24  ;;  %v4452_v24 = vld [vmem:[%s6100_s1 + $0x4a8] ss:$16 sps:$4 sm:$0xff]  }
  0x95   :  { %1971 = vmatmul.mubr.bf16.gmra.mrb[44].mxu1 %v198_v21  ;;  %1584 = vmatpush1.bf16.msra.mxu0 %v4359_v28  ;;  %v4406_v21 = vld [vmem:[%s6100_s1 + $0x3ac] ss:$16 sps:$4 sm:$0xff]  }
  0x96   :  { %2034 = vmatpush1.bf16.msra.mxu1 %v4362_v30  ;;  %1585 = vmatprep.subr.bf16.mxu0 %v4367_v35  ;;  %v4412_v28 = vld [vmem:[%s6100_s1 + $0x3cc] ss:$16 sps:$4 sm:$0xff]   ;;  %v4407_v30 = vld [vmem:[%s6100_s1 + $0x3e0] ss:$16 sps:$4 sm:$0xff]  }
  0x97   :  { %2035 = vmatprep.subr.bf16.mxu1 %v4370_v36  ;;  %1980 = vmatprep.mubr.bf16.mxu1 %v206_v32  ;;  %v4410_v32 = vld [vmem:[%s6100_s1 + $0x3c8] ss:$16 sps:$4 sm:$0xff]   ;;  %v4415_v36 = vld [vmem:[%s6100_s1 + $0x404] ss:$16 sps:$4 sm:$0xff]  }
  0x98   :  { %1529 = vmatmul.mubr.bf16.gmra.mrb[16].mxu0 %v205_v38  ;;  %v74_v35 = vld [vmem:[%s6099_s0 + $0x48] sm:$0xff] }
  0x99   :  { %1586 = vmatpush1.bf16.msra.mxu0 %v4365_v37  ;;  %1538 = vmatprep.mubr.bf16.mxu0 %v213_v46  ;;  %v4418_v37 = vld [vmem:[%s6100_s1 + $0x3ec] ss:$16 sps:$4 sm:$0xff]  }
  0x9a   :  { %2036 = vmatpush1.bf16.msra.mxu1 %v4368_v39  ;;  %1587 = vmatprep.subr.bf16.mxu0 %v4373_v43  ;;  %v82_v39 = vld [vmem:[%s6099_s0 + $0x88] sm:$0xff] }
  0x9b   :  { %2037 = vmatprep.subr.bf16.mxu1 %v4376_v44  ;;  %v4416_v43 = vld [vmem:[%s6100_s1 + $0x3e8] ss:$16 sps:$4 sm:$0xff]   ;;  %v4421_v44 = vld [vmem:[%s6100_s1 + $0x424] ss:$16 sps:$4 sm:$0xff]   ;;  %v187_v48 = vpack.c.bf16 %v89_v40, %v82_v39 }
  0x9c   :  { %v138_v40 = vld [vmem:[%s6099_s0 + $0x248] sm:$0xff] }
  0x9d   :  { %1981 = vmatmul.mubr.bf16.gmra.mrb[48].mxu1 %v205_v38  ;;  %1588 = vmatpush1.bf16.msra.mxu0 %v4371_v45  ;;  %v179_v38 = vpack.c.bf16 %v74_v35, %v67_v34  ;;  %v4424_v45 = vld [vmem:[%s6100_s1 + $0x40c] ss:$16 sps:$4 sm:$0xff]   ;;  %v4458_v34 = vld [vmem:[%s6100_s1 + $0x4c8] ss:$16 sps:$4 sm:$0xff]   ;;  %v123_v35 = vld [vmem:[%s6099_s0 + $0x1d0] sm:$0xff] }
  0x9e   :  { %2038 = vmatpush1.bf16.msra.mxu1 %v4374_v47  ;;  %1589 = vmatprep.subr.bf16.mxu0 %v4379_v50  ;;  %v4422_v47 = vld [vmem:[%s6100_s1 + $0x408] ss:$16 sps:$4 sm:$0xff]  }
  0x9f   :  { %2039 = vmatprep.subr.bf16.mxu1 %v4382_v51  ;;  %1990 = vmatprep.mubr.bf16.mxu1 %v213_v46  ;;  %v4419_v46 = vld [vmem:[%s6100_s1 + $0x420] ss:$16 sps:$4 sm:$0xff]   ;;  %v88_v50 = vld [vmem:[%s6099_s0 + $0xb8] sm:$0xff]  ;;  %v4427_v51 = vld [vmem:[%s6100_s1 + $0x444] ss:$16 sps:$4 sm:$0xff]  }
  0xa0   :  { %1539 = vmatmul.mubr.bf16.gmra.mrb[20].mxu0 %v212_v55 }
  0xa1   :  { %1590 = vmatpush1.bf16.msra.mxu0 %v4377_v52  ;;  %1548 = vmatprep.mubr.bf16.mxu0 %v220_v60  ;;  %v4430_v52 = vld [vmem:[%s6100_s1 + $0x42c] ss:$16 sps:$4 sm:$0xff]  }
  0xa2   :  { %2040 = vmatpush1.bf16.msra.mxu1 %v4380_v54  ;;  %1591 = vmatprep.subr.bf16.mxu0 %v4385_v58  ;;  %v4425_v54 = vld [vmem:[%s6100_s1 + $0x440] ss:$16 sps:$4 sm:$0xff]  }
  0xa3   :  { %2041 = vmatprep.subr.bf16.mxu1 %v4388_v59  ;;  %v103_v58 = vld [vmem:[%s6099_s0 + $0x130] sm:$0xff] }
  0xa4   :  { %v4433_v59 = vld [vmem:[%s6100_s1 + $0x464] ss:$16 sps:$4 sm:$0xff]  }
  0xa5   :  { %1991 = vmatmul.mubr.bf16.gmra.mrb[52].mxu1 %v212_v55  ;;  %1592 = vmatpush1.bf16.msra.mxu0 %v4383_v61  ;;  %v186_v55 = vpack.c.bf16 %v88_v50, %v81_v49  ;;  %v4431_v61 = vld [vmem:[%s6100_s1 + $0x460] ss:$16 sps:$4 sm:$0xff]   ;;  %v4470_v49 = vld [vmem:[%s6100_s1 + $0x508] ss:$16 sps:$4 sm:$0xff]  }
  0xa6   :  { %2042 = vmatpush1.bf16.msra.mxu1 %v4386_v62  ;;  %1593 = vmatprep.subr.bf16.mxu0 %v4391_v3  ;;  %v194_v62 = vpack.c.bf16 %v103_v58, %v96_v57  ;;  %v102_v3 = vld [vmem:[%s6099_s0 + $0x128] sm:$0xff]  ;;  %v137_v50 = vld [vmem:[%s6099_s0 + $0x240] sm:$0xff] }
  0xa7   :  { %2043 = vmatprep.subr.bf16.mxu1 %v4394_v4  ;;  %2000 = vmatprep.mubr.bf16.mxu1 %v220_v60  ;;  %v4436_v60 = vld [vmem:[%s6100_s1 + $0x44c] ss:$16 sps:$4 sm:$0xff]   ;;  %v4439_v4 = vld [vmem:[%s6100_s1 + $0x484] ss:$16 sps:$4 sm:$0xff]   ;;  %v193_v9 = vpack.c.bf16 %v102_v3, %v95_v2 }
  0xa8   :  { %1549 = vmatmul.mubr.bf16.gmra.mrb[24].mxu0 %v219_v7  ;;  %v4481_v58 = vld [vmem:[%s6100_s1 + $0x564] ss:$16 sps:$4 sm:$0xff]  }
  0xa9   :  { %1594 = vmatpush1.bf16.msra.mxu0 %v4389_v5  ;;  %1558 = vmatprep.mubr.bf16.mxu0 %v227_v14  ;;  %v4442_v5 = vld [vmem:[%s6100_s1 + $0x46c] ss:$16 sps:$4 sm:$0xff]   ;;  %v151_v3 = vld [vmem:[%s6099_s0 + $0x2b0] sm:$0xff] }
  0xaa   :  { %2044 = vmatpush1.bf16.msra.mxu1 %v4392_v6  ;;  %1595 = vmatprep.subr.bf16.mxu0 %v4397_v11  ;;  %v4437_v6 = vld [vmem:[%s6100_s1 + $0x480] ss:$16 sps:$4 sm:$0xff]  }
  0xab   :  { %2045 = vmatprep.subr.bf16.mxu1 %v4400_v12  ;;  %v117_v11 = vld [vmem:[%s6099_s0 + $0x1a0] sm:$0xff] }
  0xac   :  { %v4445_v12 = vld [vmem:[%s6100_s1 + $0x4a4] ss:$16 sps:$4 sm:$0xff]  }
  0xad   :  { %2001 = vmatmul.mubr.bf16.gmra.mrb[56].mxu1 %v219_v7  ;;  %1596 = vmatpush1.bf16.msra.mxu0 %v4395_v13  ;;  %v4440_v7 = vld [vmem:[%s6100_s1 + $0x468] ss:$16 sps:$4 sm:$0xff]   ;;  %v4448_v13 = vld [vmem:[%s6100_s1 + $0x48c] ss:$16 sps:$4 sm:$0xff]  }
  0xae   :  { %2046 = vmatpush1.bf16.msra.mxu1 %v4398_v15  ;;  %1597 = vmatprep.subr.bf16.mxu0 %v4403_v20  ;;  %v4443_v15 = vld [vmem:[%s6100_s1 + $0x4a0] ss:$16 sps:$4 sm:$0xff]   ;;  %v116_v20 = vld [vmem:[%s6099_s0 + $0x198] sm:$0xff] }
  0xaf   :  { %2047 = vmatprep.subr.bf16.mxu1 %v4406_v21  ;;  %2010 = vmatprep.mubr.bf16.mxu1 %v227_v14  ;;  %v201_v14 = vpack.c.bf16 %v117_v11, %v110_v10  ;;  %v4451_v21 = vld [vmem:[%s6100_s1 + $0x4c4] ss:$16 sps:$4 sm:$0xff]   ;;  %v200_v25 = vpack.c.bf16 %v116_v20, %v109_v18  ;;  %v4485_v10 = vld [vmem:[%s6100_s1 + $0x580] ss:$16 sps:$4 sm:$0xff]   ;;  %v4488_v11 = vld [vmem:[%s6100_s1 + $0x568] ss:$16 sps:$4 sm:$0xff]  }
  0xb0   :  { %1559 = vmatmul.mubr.bf16.gmra.mrb[28].mxu0 %v226_v23  ;;  %v165_v20 = vld [vmem:[%s6099_s0 + $0x320] sm:$0xff] }
  0xb1   :  { %1598 = vmatpush1.bf16.msra.mxu0 %v4401_v22  ;;  %1601 = vmatprep.mubr.bf16.mxu0 %v180_v33  ;;  %v4454_v22 = vld [vmem:[%s6100_s1 + $0x4ac] ss:$16 sps:$4 sm:$0xff]  }
  0xb2   :  { %2048 = vmatpush1.bf16.msra.mxu1 %v4404_v26  ;;  %1599 = vmatprep.subr.bf16.mxu0 %v4409_v27  ;;  %v124_v26 = vld [vmem:[%s6099_s0 + $0x1d8] sm:$0xff]  ;;  %v131_v27 = vld [vmem:[%s6099_s0 + $0x210] sm:$0xff] }
  0xb3   :  { %2049 = vmatprep.subr.bf16.mxu1 %v4412_v28  ;;  %v4457_v28 = vld [vmem:[%s6100_s1 + $0x4e4] ss:$16 sps:$4 sm:$0xff]  }
  0xb5   :  { %2011 = vmatmul.mubr.bf16.gmra.mrb[60].mxu1 %v226_v23  ;;  %1600 = vmatpush1.bf16.msra.mxu0 %v4407_v30  ;;  %v4449_v23 = vld [vmem:[%s6100_s1 + $0x4c0] ss:$16 sps:$4 sm:$0xff]   ;;  %v4460_v30 = vld [vmem:[%s6100_s1 + $0x4cc] ss:$16 sps:$4 sm:$0xff]  }
  0xb6   :  { %2050 = vmatpush1.bf16.msra.mxu1 %v4410_v32  ;;  %1682 = vmatprep.subr.bf16.mxu0 %v4415_v36  ;;  %v4455_v32 = vld [vmem:[%s6100_s1 + $0x4e0] ss:$16 sps:$4 sm:$0xff]   ;;  %v130_v36 = vld [vmem:[%s6099_s0 + $0x208] sm:$0xff] }
  0xb7   :  { %2051 = vmatprep.subr.bf16.mxu1 %v4418_v37  ;;  %2053 = vmatprep.mubr.bf16.mxu1 %v180_v33  ;;  %v208_v33 = vpack.c.bf16 %v131_v27, %v124_v26  ;;  %v4463_v37 = vld [vmem:[%s6100_s1 + $0x504] ss:$16 sps:$4 sm:$0xff]   ;;  %v207_v39 = vpack.c.bf16 %v130_v36, %v123_v35  ;;  %v4497_v26 = vld [vmem:[%s6100_s1 + $0x5c0] ss:$16 sps:$4 sm:$0xff]   ;;  %v4500_v27 = vld [vmem:[%s6100_s1 + $0x5a8] ss:$16 sps:$4 sm:$0xff]  }
  0xb8   :  { %1602 = vmatmul.mubr.bf16.vlgmr.msra.gmra.mrb[0].mxu0 %v179_v38  ;;  %v69_v36 = vld [vmem:[%s6099_s0 + $0x20] sm:$0xff] }
  0xb9   :  { %1683 = vmatpush1.bf16.msra.mxu0 %v4413_v41  ;;  %1611 = vmatprep.mubr.bf16.mxu0 %v187_v48  ;;  %v145_v41 = vld [vmem:[%s6099_s0 + $0x280] sm:$0xff] }
  0xba   :  { %2052 = vmatpush1.bf16.msra.mxu1 %v4416_v43  ;;  %1684 = vmatprep.subr.bf16.mxu0 %v4421_v44  ;;  %v4461_v43 = vld [vmem:[%s6100_s1 + $0x500] ss:$16 sps:$4 sm:$0xff]   ;;  %v4464_v44 = vld [vmem:[%s6100_s1 + $0x4e8] ss:$16 sps:$4 sm:$0xff]  }
  0xbb   :  { %2134 = vmatprep.subr.bf16.mxu1 %v4424_v45  ;;  %v4469_v45 = vld [vmem:[%s6100_s1 + $0x524] ss:$16 sps:$4 sm:$0xff]  }
  0xbd   :  { %2054 = vmatmul.mubr.bf16.vlgmr.msra.gmra.mrb[32].mxu1 %v179_v38  ;;  %1685 = vmatpush1.bf16.msra.mxu0 %v4419_v46  ;;  %v4466_v38 = vld [vmem:[%s6100_s1 + $0x4ec] ss:$16 sps:$4 sm:$0xff]  }
  0xbe   :  { %2135 = vmatpush1.bf16.msra.mxu1 %v4422_v47  ;;  %1686 = vmatprep.subr.bf16.mxu0 %v4427_v51  ;;  %v4472_v46 = vld [vmem:[%s6100_s1 + $0x50c] ss:$16 sps:$4 sm:$0xff]   ;;  %v215_v47 = vpack.c.bf16 %v145_v41, %v138_v40  ;;  %v91_v40 = vld [vmem:[%s6099_s0 + $0xd0] sm:$0xff] }
  0xbf   :  { %2136 = vmatprep.subr.bf16.mxu1 %v4430_v52  ;;  %2063 = vmatprep.mubr.bf16.mxu1 %v187_v48  ;;  %v4467_v48 = vld [vmem:[%s6100_s1 + $0x520] ss:$16 sps:$4 sm:$0xff]   ;;  %v144_v51 = vld [vmem:[%s6099_s0 + $0x278] sm:$0xff]  ;;  %v4475_v52 = vld [vmem:[%s6100_s1 + $0x544] ss:$16 sps:$4 sm:$0xff]  }
  0xc0   :  { %1612 = vmatmul.mubr.bf16.gmra.mrb[4].mxu0 %v186_v55  ;;  %v214_v57 = vpack.c.bf16 %v144_v51, %v137_v50  ;;  %v83_v50 = vld [vmem:[%s6099_s0 + $0x90] sm:$0xff]  ;;  %v90_v51 = vld [vmem:[%s6099_s0 + $0xc8] sm:$0xff] }
  0xc1   :  { %1687 = vmatpush1.bf16.msra.mxu0 %v4425_v54  ;;  %1621 = vmatprep.mubr.bf16.mxu0 %v194_v62  ;;  %v4478_v54 = vld [vmem:[%s6100_s1 + $0x52c] ss:$16 sps:$4 sm:$0xff]  }
  0xc2   :  { %2137 = vmatpush1.bf16.msra.mxu1 %v4428_v56  ;;  %1688 = vmatprep.subr.bf16.mxu0 %v4433_v59  ;;  %v4476_v56 = vld [vmem:[%s6100_s1 + $0x528] ss:$16 sps:$4 sm:$0xff]   ;;  %v4484_v59 = vld [vmem:[%s6100_s1 + $0x54c] ss:$16 sps:$4 sm:$0xff]  }
  0xc3   :  { %2138 = vmatprep.subr.bf16.mxu1 %v4436_v60  ;;  %v152_v60 = vld [vmem:[%s6099_s0 + $0x2b8] sm:$0xff] }
  0xc5   :  { %2064 = vmatmul.mubr.bf16.gmra.mrb[36].mxu1 %v186_v55  ;;  %1689 = vmatpush1.bf16.msra.mxu0 %v4431_v61  ;;  %v4473_v55 = vld [vmem:[%s6100_s1 + $0x540] ss:$16 sps:$4 sm:$0xff]  }
  0xc6   :  { %2139 = vmatpush1.bf16.msra.mxu1 %v4434_v63  ;;  %1690 = vmatprep.subr.bf16.mxu0 %v4439_v4  ;;  %v159_v61 = vld [vmem:[%s6099_s0 + $0x2f0] sm:$0xff]  ;;  %v4482_v63 = vld [vmem:[%s6100_s1 + $0x548] ss:$16 sps:$4 sm:$0xff]  }
  0xc7   :  { %2140 = vmatprep.subr.bf16.mxu1 %v4442_v5  ;;  %2073 = vmatprep.mubr.bf16.mxu1 %v194_v62  ;;  %v4479_v62 = vld [vmem:[%s6100_s1 + $0x560] ss:$16 sps:$4 sm:$0xff]   ;;  %v222_v2 = vpack.c.bf16 %v159_v61, %v152_v60  ;;  %v158_v4 = vld [vmem:[%s6099_s0 + $0x2e8] sm:$0xff]  ;;  %v4487_v5 = vld [vmem:[%s6100_s1 + $0x584] ss:$16 sps:$4 sm:$0xff]  }
  0xc8   :  { %1622 = vmatmul.mubr.bf16.gmra.mrb[8].mxu0 %v193_v9  ;;  %v97_v60 = vld [vmem:[%s6099_s0 + $0x100] sm:$0xff]  ;;  %v104_v61 = vld [vmem:[%s6099_s0 + $0x138] sm:$0xff] }
  0xc9   :  { %1691 = vmatpush1.bf16.msra.mxu0 %v4437_v6  ;;  %1631 = vmatprep.mubr.bf16.mxu0 %v201_v14  ;;  %v4490_v6 = vld [vmem:[%s6100_s1 + $0x56c] ss:$16 sps:$4 sm:$0xff]  }
  0xca   :  { %2141 = vmatpush1.bf16.msra.mxu1 %v4440_v7  ;;  %1692 = vmatprep.subr.bf16.mxu0 %v4445_v12  ;;  %v166_v7 = vld [vmem:[%s6099_s0 + $0x328] sm:$0xff]  ;;  %v221_v12 = vpack.c.bf16 %v158_v4, %v151_v3  ;;  %v4524_v3 = vld [vmem:[#allocation5 + $0x30] ss:$8 sps:$4 sm:$0xff]  }
  0xcb   :  { %2142 = vmatprep.subr.bf16.mxu1 %v4448_v13  ;;  %v4493_v13 = vld [vmem:[%s6100_s1 + $0x5a4] ss:$16 sps:$4 sm:$0xff]   ;;  %v4529_v4 = vld [vmem:[#allocation5 + $0x44] ss:$8 sps:$4 sm:$0xff]  }
  0xcd   :  { %2074 = vmatmul.mubr.bf16.gmra.mrb[40].mxu1 %v193_v9  ;;  %1693 = vmatpush1.bf16.msra.mxu0 %v4443_v15  ;;  %v173_v9 = vld [vmem:[%s6099_s0 + $0x360] sm:$0xff] }
  0xce   :  { %2143 = vmatpush1.bf16.msra.mxu1 %v4446_v17  ;;  %1694 = vmatprep.subr.bf16.mxu0 %v4451_v21  ;;  %v4491_v15 = vld [vmem:[%s6100_s1 + $0x5a0] ss:$16 sps:$4 sm:$0xff]   ;;  %v4494_v17 = vld [vmem:[%s6100_s1 + $0x588] ss:$16 sps:$4 sm:$0xff]   ;;  %v229_v18 = vpack.c.bf16 %v173_v9, %v166_v7  ;;  %v4527_v7 = vld [vmem:[#allocation5 + $0x40] ss:$8 sps:$4 sm:$0xff]  }
  0xcf   :  { %2144 = vmatprep.subr.bf16.mxu1 %v4454_v22  ;;  %2083 = vmatprep.mubr.bf16.mxu1 %v201_v14  ;;  %v4496_v14 = vld [vmem:[%s6100_s1 + $0x58c] ss:$16 sps:$4 sm:$0xff]   ;;  %v4499_v22 = vld [vmem:[%s6100_s1 + $0x5c4] ss:$16 sps:$4 sm:$0xff]   ;;  %v4532_v9 = vld [vmem:[#allocation5 + $0x54] ss:$8 sps:$4 sm:$0xff]  }
  0xd0   :  { %1632 = vmatmul.mubr.bf16.gmra.mrb[12].mxu0 %v200_v25  ;;  %v172_v21 = vld [vmem:[%s6099_s0 + $0x358] sm:$0xff] }
  0xd1   :  { %1695 = vmatpush1.bf16.msra.mxu0 %v4449_v23  ;;  %1641 = vmatprep.mubr.bf16.mxu0 %v208_v33  ;;  %v4502_v23 = vld [vmem:[%s6100_s1 + $0x5ac] ss:$16 sps:$4 sm:$0xff]  }
  0xd2   :  { %2145 = vmatpush1.bf16.msra.mxu1 %v4452_v24  ;;  %1696 = vmatprep.subr.bf16.mxu0 %v4457_v28  ;;  %v70_v24 = vld [vmem:[%s6099_s0 + $0x28] sm:$0xff]  ;;  %v228_v28 = vpack.c.bf16 %v172_v21, %v165_v20 }
  0xd3   :  { %2146 = vmatprep.subr.bf16.mxu1 %v4460_v30  ;;  %v4505_v30 = vld [vmem:[%s6100_s1 + $0x5e4] ss:$16 sps:$4 sm:$0xff]  }
  0xd4   :  { %v4533_v20 = vld [vmem:[#allocation5 + $0x60] ss:$8 sps:$4 sm:$0xff]  }
  0xd5   :  { %2084 = vmatmul.mubr.bf16.gmra.mrb[44].mxu1 %v200_v25  ;;  %1697 = vmatpush1.bf16.msra.mxu0 %v4455_v32  ;;  %v77_v25 = vld [vmem:[%s6099_s0 + $0x60] sm:$0xff]  ;;  %v4508_v32 = vld [vmem:[%s6100_s1 + $0x5cc] ss:$16 sps:$4 sm:$0xff]  }
  0xd6   :  { %2147 = vmatpush1.bf16.msra.mxu1 %v4458_v34  ;;  %1698 = vmatprep.subr.bf16.mxu0 %v4463_v37  ;;  %v4506_v34 = vld [vmem:[%s6100_s1 + $0x5c8] ss:$16 sps:$4 sm:$0xff]   ;;  %v182_v35 = vpack.c.bf16 %v77_v25, %v70_v24  ;;  %v125_v25 = vld [vmem:[%s6099_s0 + $0x1e0] sm:$0xff] }
  0xd7   :  { %2148 = vmatprep.subr.bf16.mxu1 %v4466_v38  ;;  %2093 = vmatprep.mubr.bf16.mxu1 %v208_v33  ;;  %v4503_v33 = vld [vmem:[%s6100_s1 + $0x5e0] ss:$16 sps:$4 sm:$0xff]   ;;  %v76_v37 = vld [vmem:[%s6099_s0 + $0x58] sm:$0xff] }
  0xd8   :  { %1642 = vmatmul.mubr.bf16.gmra.mrb[16].mxu0 %v207_v39  ;;  %v4511_v38 = vld [vmem:[%s6100_s1 + $0x5ec] ss:$16 sps:$4 sm:$0xff]   ;;  %v181_v41 = vpack.c.bf16 %v76_v37, %v69_v36 }
  0xd9   :  { %1699 = vmatpush1.bf16.msra.mxu0 %v4461_v43  ;;  %1651 = vmatprep.mubr.bf16.mxu0 %v215_v47  ;;  %v4517_v43 = vld [vmem:[#allocation5 + $0x4] ss:$8 sps:$4 sm:$0xff]   ;;  %v4539_v36 = vld [vmem:[#allocation5 + $0x80] ss:$8 sps:$4 sm:$0xff]  }
  0xda   :  { %2149 = vmatpush1.bf16.msra.mxu1 %v4464_v44  ;;  %1700 = vmatprep.subr.bf16.mxu0 %v4469_v45  ;;  %v4509_v44 = vld [vmem:[%s6100_s1 + $0x5e8] ss:$16 sps:$4 sm:$0xff]  }
  0xdb   :  { %2150 = vmatprep.subr.bf16.mxu1 %v4472_v46  ;;  %v4514_v46 = vld [vmem:[%s6100_s1 + $0x60c] ss:$16 sps:$4 sm:$0xff]  }
  0xdd   :  { %2094 = vmatmul.mubr.bf16.gmra.mrb[48].mxu1 %v207_v39  ;;  %1701 = vmatpush1.bf16.msra.mxu0 %v4467_v48  ;;  %v84_v39 = vld [vmem:[%s6099_s0 + $0x98] sm:$0xff] }
  0xde   :  { %2151 = vmatpush1.bf16.msra.mxu1 %v4470_v49  ;;  %1702 = vmatprep.subr.bf16.mxu0 %v4475_v52  ;;  %v189_v45 = vpack.c.bf16 %v91_v40, %v84_v39  ;;  %v4520_v48 = vld [vmem:[#allocation5 + $0x14] ss:$8 sps:$4 sm:$0xff]   ;;  %v98_v52 = vld [vmem:[%s6099_s0 + $0x108] sm:$0xff] }
  0xdf   :  { %2152 = vmatprep.subr.bf16.mxu1 %v4478_v54  ;;  %2103 = vmatprep.mubr.bf16.mxu1 %v215_v47  ;;  %v4515_v47 = vld [vmem:[#allocation5] ss:$8 sps:$4 sm:$0xff]   ;;  %v4512_v49 = vld [vmem:[%s6100_s1 + $0x608] ss:$16 sps:$4 sm:$0xff]  }
  0xe0   :  { %1652 = vmatmul.mubr.bf16.gmra.mrb[20].mxu0 %v214_v57  ;;  %v105_v54 = vld [vmem:[%s6099_s0 + $0x140] sm:$0xff] }
  0xe1   :  { %1703 = vmatpush1.bf16.msra.mxu0 %v4473_v55  ;;  %1661 = vmatprep.mubr.bf16.mxu0 %v222_v2  ;;  %v4518_v55 = vld [vmem:[#allocation5 + $0x10] ss:$8 sps:$4 sm:$0xff]  }
  0xe2   :  { %2153 = vmatpush1.bf16.msra.mxu1 %v4476_v56  ;;  %1704 = vmatprep.subr.bf16.mxu0 %v4481_v58  ;;  %v4523_v56 = vld [vmem:[#allocation5 + $0x24] ss:$8 sps:$4 sm:$0xff]   ;;  %v196_v58 = vpack.c.bf16 %v105_v54, %v98_v52  ;;  %v4550_v54 = vld [vmem:[#allocation5 + $0xb4] ss:$8 sps:$4 sm:$0xff]  }
  0xe3   :  { %2154 = vmatprep.subr.bf16.mxu1 %v4484_v59  ;;  %v4521_v59 = vld [vmem:[#allocation5 + $0x20] ss:$8 sps:$4 sm:$0xff]  }
  0xe5   :  { %2104 = vmatmul.mubr.bf16.gmra.mrb[52].mxu1 %v214_v57  ;;  %1705 = vmatpush1.bf16.msra.mxu0 %v4479_v62  ;;  %v188_v57 = vpack.c.bf16 %v90_v51, %v83_v50  ;;  %v4526_v62 = vld [vmem:[#allocation5 + $0x34] ss:$8 sps:$4 sm:$0xff]   ;;  %v4545_v51 = vld [vmem:[#allocation5 + $0xa0] ss:$8 sps:$4 sm:$0xff]  }
  0xe6   :  { %2155 = vmatpush1.bf16.msra.mxu1 %v4482_v63  ;;  %1706 = vmatprep.subr.bf16.mxu0 %v4487_v5  ;;  %v112_v63 = vld [vmem:[%s6099_s0 + $0x178] sm:$0xff]  ;;  %v195_v5 = vpack.c.bf16 %v104_v61, %v97_v60  ;;  %v175_v61 = vld [vmem:[%s6099_s0 + $0x370] sm:$0xff] }
  0xe7   :  { %2156 = vmatprep.subr.bf16.mxu1 %v4490_v6  ;;  %2113 = vmatprep.mubr.bf16.mxu1 %v222_v2  ;;  %v119_v2 = vld [vmem:[%s6099_s0 + $0x1b0] sm:$0xff]  ;;  %v168_v60 = vld [vmem:[%s6099_s0 + $0x338] sm:$0xff] }
  0xe8   :  { %1662 = vmatmul.mubr.bf16.gmra.mrb[24].mxu0 %v221_v12  ;;  %v203_v6 = vpack.c.bf16 %v119_v2, %v112_v63  ;;  %v4553_v63 = vld [vmem:[#allocation5 + $0xc4] ss:$8 sps:$4 sm:$0xff]  }
  0xe9   :  { %1707 = vmatpush1.bf16.msra.mxu0 %v4485_v10  ;;  %1671 = vmatprep.mubr.bf16.mxu0 %v229_v18  ;;  %v111_v10 = vld [vmem:[%s6099_s0 + $0x170] sm:$0xff] }
  0xea   :  { %2157 = vmatpush1.bf16.msra.mxu1 %v4488_v11  ;;  %1708 = vmatprep.subr.bf16.mxu0 %v4493_v13  ;;  %v118_v11 = vld [vmem:[%s6099_s0 + $0x1a8] sm:$0xff]  ;;  %v133_v13 = vld [vmem:[%s6099_s0 + $0x220] sm:$0xff] }
  0xeb   :  { %2158 = vmatprep.subr.bf16.mxu1 %v4496_v14  ;;  %v4530_v14 = vld [vmem:[#allocation5 + $0x50] ss:$8 sps:$4 sm:$0xff]  }
  0xed   :  { %2114 = vmatmul.mubr.bf16.gmra.mrb[56].mxu1 %v221_v12  ;;  %1709 = vmatpush1.bf16.msra.mxu0 %v4491_v15  ;;  %v126_v12 = vld [vmem:[%s6099_s0 + $0x1e8] sm:$0xff] }
  0xee   :  { %2159 = vmatpush1.bf16.msra.mxu1 %v4494_v17  ;;  %1710 = vmatprep.subr.bf16.mxu0 %v4499_v22  ;;  %v4535_v15 = vld [vmem:[#allocation5 + $0x64] ss:$8 sps:$4 sm:$0xff]   ;;  %v202_v17 = vpack.c.bf16 %v118_v11, %v111_v10  ;;  %v4538_v22 = vld [vmem:[#allocation5 + $0x74] ss:$8 sps:$4 sm:$0xff]  }
  0xef   :  { %2160 = vmatprep.subr.bf16.mxu1 %v4502_v23  ;;  %2123 = vmatprep.mubr.bf16.mxu1 %v229_v18  ;;  %v210_v18 = vpack.c.bf16 %v133_v13, %v126_v12  ;;  %v174_v10 = vld [vmem:[%s6099_s0 + $0x368] sm:$0xff] }
  0xf0   :  { %1672 = vmatmul.mubr.bf16.gmra.mrb[28].mxu0 %v228_v28 }
  0xf1   :  { %1711 = vmatpush1.bf16.msra.mxu0 %v4497_v26  ;;  %1714 = vmatprep.mubr.bf16.mxu0 %v182_v35  ;;  %v132_v26 = vld [vmem:[%s6099_s0 + $0x218] sm:$0xff] }
  0xf2   :  { %2161 = vmatpush1.bf16.msra.mxu1 %v4500_v27  ;;  %1712 = vmatprep.subr.bf16.mxu0 %v4505_v30  ;;  %v147_v30 = vld [vmem:[%s6099_s0 + $0x290] sm:$0xff] }
  0xf3   :  { %2162 = vmatprep.subr.bf16.mxu1 %v4508_v32  ;;  %v4536_v32 = vld [vmem:[#allocation5 + $0x70] ss:$8 sps:$4 sm:$0xff]  }
  0xf5   :  { %2124 = vmatmul.mubr.bf16.gmra.mrb[60].mxu1 %v228_v28  ;;  %1713 = vmatpush1.bf16.msra.mxu0 %v4503_v33  ;;  %v140_v28 = vld [vmem:[%s6099_s0 + $0x258] sm:$0xff]  ;;  %v4541_v33 = vld [vmem:[#allocation5 + $0x84] ss:$8 sps:$4 sm:$0xff]  }
  0xf6   :  { %2163 = vmatpush1.bf16.msra.mxu1 %v4506_v34  ;;  %2166 = vmatprep.mubr.bf16.mxu1 %v182_v35  ;;  %v209_v34 = vpack.c.bf16 %v132_v26, %v125_v25  ;;  %v217_v35 = vpack.c.bf16 %v147_v30, %v140_v28 }
  0xf7   :  { %2164 = vmatprep.subr.bf16.mxu1 %v4511_v38  ;;  %2852 = vmatprep.subr.bf16.mxu0 %v4517_v43  ;;  %v4544_v38 = vld [vmem:[#allocation5 + $0x94] ss:$8 sps:$4 sm:$0xff]   ;;  %v146_v43 = vld [vmem:[%s6099_s0 + $0x288] sm:$0xff] }
  0xf8   :  { %1715 = vmatmul.mubr.bf16.vlgmr.msra.gmra.mrb[0].mxu0 %v181_v41 }
  0xf9   :  { %1724 = vmatprep.mubr.bf16.mxu0 %v189_v45  ;;  %2853 = vmatpush1.bf16.msra.mxu0 %v4515_v47  ;;  %v4542_v47 = vld [vmem:[#allocation5 + $0x90] ss:$8 sps:$4 sm:$0xff]  }
  0xfa   :  { %2165 = vmatpush1.bf16.msra.mxu1 %v4509_v44  ;;  %2854 = vmatprep.subr.bf16.mxu0 %v4520_v48  ;;  %v4547_v48 = vld [vmem:[#allocation5 + $0xa4] ss:$8 sps:$4 sm:$0xff]  }
  0xfb   :  { %2247 = vmatprep.subr.bf16.mxu1 %v4514_v46  ;;  %v161_v46 = vld [vmem:[%s6099_s0 + $0x300] sm:$0xff] }
  0xfd   :  { %2167 = vmatmul.mubr.bf16.vlgmr.msra.gmra.mrb[32].mxu1 %v181_v41  ;;  %2855 = vmatpush1.bf16.msra.mxu0 %v4518_v55  ;;  %v139_v41 = vld [vmem:[%s6099_s0 + $0x250] sm:$0xff] }
  0xfe   :  { %2248 = vmatpush1.bf16.msra.mxu1 %v4512_v49  ;;  %2176 = vmatprep.mubr.bf16.mxu1 %v189_v45  ;;  %v154_v45 = vld [vmem:[%s6099_s0 + $0x2c8] sm:$0xff]  ;;  %v216_v49 = vpack.c.bf16 %v146_v43, %v139_v41  ;;  %v4562_v43 = vld [vmem:[#allocation5 + $0xf4] ss:$8 sps:$4 sm:$0xff]  }
  0xff   :  { %2856 = vmatprep.subr.bf16.mxu0 %v4523_v56  ;;  %v224_v50 = vpack.c.bf16 %v161_v46, %v154_v45  ;;  %v4557_v41 = vld [vmem:[#allocation5 + $0xe0] ss:$8 sps:$4 sm:$0xff]   ;;  %v4560_v45 = vld [vmem:[#allocation5 + $0xf0] ss:$8 sps:$4 sm:$0xff]   ;;  %v4565_v46 = vld [vmem:[#allocation5 + $0x104] ss:$8 sps:$4 sm:$0xff]  }
 0x100   :  { %1725 = vmatmul.mubr.bf16.gmra.mrb[4].mxu0 %v188_v57 }
 0x101   :  { %1734 = vmatprep.mubr.bf16.mxu0 %v196_v58  ;;  %2857 = vmatpush1.bf16.msra.mxu0 %v4521_v59 }
 0x102   :  { %2858 = vmatprep.subr.bf16.mxu0 %v4526_v62  ;;  %v4548_v62 = vld [vmem:[#allocation5 + $0xb0] ss:$8 sps:$4 sm:$0xff]  }
 0x105   :  { %2177 = vmatmul.mubr.bf16.gmra.mrb[36].mxu1 %v188_v57  ;;  %2859 = vmatpush1.bf16.msra.mxu0 %v4524_v3  ;;  %v153_v57 = vld [vmem:[%s6099_s0 + $0x2c0] sm:$0xff]  ;;  %v231_v3 = vpack.c.bf16 %v175_v61, %v168_v60 }
 0x106   :  { %2186 = vmatprep.mubr.bf16.mxu1 %v196_v58  ;;  %2860 = vmatprep.subr.bf16.mxu0 %v4529_v4  ;;  %v160_v58 = vld [vmem:[%s6099_s0 + $0x2f8] sm:$0xff]  ;;  %v4551_v4 = vld [vmem:[#allocation5 + $0xc0] ss:$8 sps:$4 sm:$0xff]  }
 0x107   :  { %v223_v2 = vpack.c.bf16 %v160_v58, %v153_v57 }
 0x108   :  { %1735 = vmatmul.mubr.bf16.gmra.mrb[8].mxu0 %v195_v5 }
 0x109   :  { %1744 = vmatprep.mubr.bf16.mxu0 %v203_v6  ;;  %2861 = vmatpush1.bf16.msra.mxu0 %v4527_v7 }
 0x10a   :  { %2862 = vmatprep.subr.bf16.mxu0 %v4532_v9  ;;  %v167_v9 = vld [vmem:[%s6099_s0 + $0x330] sm:$0xff] }
 0x10b   :  { %v230_v12 = vpack.c.bf16 %v174_v10, %v167_v9 }
 0x10d   :  { %2187 = vmatmul.mubr.bf16.gmra.mrb[40].mxu1 %v195_v5  ;;  %2863 = vmatpush1.bf16.msra.mxu0 %v4530_v14 }
 0x10e   :  { %2196 = vmatprep.mubr.bf16.mxu1 %v203_v6  ;;  %2864 = vmatprep.subr.bf16.mxu0 %v4535_v15 }
 0x110   :  { %v5728_v21 = vpop.f32.mrb[0].mxu1  ;;  %1745 = vmatmul.mubr.bf16.gmra.mrb[12].mxu0 %v202_v17 }
 0x111   :  { %v5730_v23 = vpop.f32.mrb[1].mxu1  ;;  %1754 = vmatprep.mubr.bf16.mxu0 %v210_v18  ;;  %2865 = vmatpush1.bf16.msra.mxu0 %v4533_v20 }
 0x112   :  { %v5732_v24 = vpop.f32.mrb[2].mxu1  ;;  %2866 = vmatprep.subr.bf16.mxu0 %v4538_v22 }
 0x113   :  { %v5740_v27 = vpop.f32.mrb[3].mxu1 }
 0x115   :  { %2197 = vmatmul.mubr.bf16.gmra.mrb[44].mxu1 %v202_v17  ;;  %2867 = vmatpush1.bf16.msra.mxu0 %v4536_v32 }
 0x116   :  { %2206 = vmatprep.mubr.bf16.mxu1 %v210_v18  ;;  %2868 = vmatprep.subr.bf16.mxu0 %v4541_v33 }
 0x118   :  { %v5748_v37 = vpop.f32.mrb[4].mxu1  ;;  %1755 = vmatmul.mubr.bf16.gmra.mrb[16].mxu0 %v209_v34 }
 0x119   :  { %v5750_v39 = vpop.f32.mrb[5].mxu1  ;;  %1764 = vmatprep.mubr.bf16.mxu0 %v217_v35  ;;  %2869 = vmatpush1.bf16.msra.mxu0 %v4539_v36  ;;  %v4556_v36 = vld [vmem:[#allocation5 + $0xd4] ss:$8 sps:$4 sm:$0xff]  }
 0x11a   :  { %v5752_v40 = vpop.f32.mrb[6].mxu1  ;;  %2870 = vmatprep.subr.bf16.mxu0 %v4544_v38  ;;  %v4554_v38 = vld [vmem:[#allocation5 + $0xd0] ss:$8 sps:$4 sm:$0xff]  }
 0x11b   :  { %v5760_v44 = vpop.f32.mrb[7].mxu1 }
 0x11d   :  { %2207 = vmatmul.mubr.bf16.gmra.mrb[48].mxu1 %v209_v34  ;;  %2871 = vmatpush1.bf16.msra.mxu0 %v4542_v47  ;;  %v5861_v47 = vld [vmem:[#allocation2] sm:$0xf] }
 0x11e   :  { %2216 = vmatprep.mubr.bf16.mxu1 %v217_v35  ;;  %2872 = vmatprep.subr.bf16.mxu0 %v4547_v48 }
 0x120   :  { %v5768_v52 = vpop.f32.mrb[8].mxu1  ;;  %1765 = vmatmul.mubr.bf16.gmra.mrb[20].mxu0 %v216_v49 }
 0x121   :  { %v5770_v55 = vpop.f32.mrb[9].mxu1  ;;  %1774 = vmatprep.mubr.bf16.mxu0 %v224_v50  ;;  %2873 = vmatpush1.bf16.msra.mxu0 %v4545_v51 }
 0x122   :  { %v5772_v56 = vpop.f32.mrb[10].mxu1  ;;  %2874 = vmatprep.subr.bf16.mxu0 %v4550_v54 }
 0x123   :  { %v5780_v59 = vpop.f32.mrb[11].mxu1 }
 0x125   :  { %2217 = vmatmul.mubr.bf16.gmra.mrb[52].mxu1 %v216_v49  ;;  %2875 = vmatpush1.bf16.msra.mxu0 %v4548_v62 }
 0x126   :  { %2226 = vmatprep.mubr.bf16.mxu1 %v224_v50  ;;  %2876 = vmatprep.subr.bf16.mxu0 %v4553_v63 }
 0x128   :  { %v5788_v5 = vpop.f32.mrb[12].mxu1  ;;  %1775 = vmatmul.mubr.bf16.gmra.mrb[24].mxu0 %v223_v2 }
 0x129   :  { %v5790_v6 = vpop.f32.mrb[13].mxu1  ;;  %1784 = vmatprep.mubr.bf16.mxu0 %v231_v3  ;;  %2877 = vmatpush1.bf16.msra.mxu0 %v4551_v4  ;;  %v4611_v4 = vld [vmem:[%s6104_s5 + $0x40] sm:$0xff]  }
 0x12a   :  { %v5792_v7 = vpop.f32.mrb[14].mxu1  ;;  %2878 = vmatprep.subr.bf16.mxu0 %v4556_v36  ;;  %3828 = vmatprep.subr.bf16.mxu1 %v4611_v4 }
 0x12b   :  { %v5800_v11 = vpop.f32.mrb[15].mxu1 }
 0x12d   :  { %2227 = vmatmul.mubr.bf16.gmra.mrb[56].mxu1 %v223_v2  ;;  %2879 = vmatpush1.bf16.msra.mxu0 %v4554_v38 }
 0x12e   :  { %2236 = vmatprep.mubr.bf16.mxu1 %v231_v3 }
 0x130   :  { %v5802_v13 = vpop.f32.mrb[16].mxu1  ;;  %1785 = vmatmul.mubr.bf16.gmra.mrb[28].mxu0 %v230_v12 }
 0x131   :  { %v5804_v14 = vpop.f32.mrb[17].mxu1 }
 0x132   :  { %v5806_v15 = vpop.f32.mrb[18].mxu1 }
 0x133   :  { %v5808_v17 = vpop.f32.mrb[19].mxu1 }
 0x135   :  { %2237 = vmatmul.mubr.bf16.gmra.mrb[60].mxu1 %v230_v12 }
 0x136   :  { %2279 = vmatprep.mubr.bf16.mxu1 %v4726_v0 }
 0x138   :  { %v5811_v18 = vpop.f32.mrb[20].mxu1 }
 0x139   :  { %v5813_v20 = vpop.f32.mrb[21].mxu1 }
 0x13a   :  { %v5815_v22 = vpop.f32.mrb[22].mxu1 }
 0x13b   :  { %v5817_v25 = vpop.f32.mrb[23].mxu1 }
 0x13d   :  { %3660 = vmatmul.mubr.msk.bf16.vlgmr.msra.gmra.mrb[32].mxu1 %vm1431_vm0, %v4828_v8 }
 0x13e   :  { %2289 = vmatprep.mubr.bf16.mxu1 %v4726_v0 }
 0x140   :  { %v5822_v26 = vpop.f32.mrb[24].mxu1 }
 0x141   :  { %v5824_v28 = vpop.f32.mrb[25].mxu1 }
 0x142   :  { %v5826_v30 = vpop.f32.mrb[26].mxu1 }
 0x143   :  { %v5828_v32 = vpop.f32.mrb[27].mxu1 }
 0x145   :  { %3661 = vmatmul.mubr.msk.bf16.gmra.mrb[36].mxu1 %vm1431_vm0, %v4863_v19  ;;  %v4559_v19 = vld [vmem:[#allocation5 + $0xe4] ss:$8 sps:$4 sm:$0xff]  }
 0x146   :  { %2299 = vmatprep.mubr.bf16.mxu1 %v4726_v0  ;;  %2880 = vmatprep.subr.bf16.mxu0 %v4559_v19 }
 0x147   :  { %2881 = vmatpush1.bf16.msra.mxu0 %v4557_v41 }
 0x148   :  { %v5833_v33 = vpop.f32.mrb[28].mxu1  ;;  %2882 = vmatprep.subr.bf16.mxu0 %v4562_v43  ;;  %v4563_v43 = vld [vmem:[#allocation5 + $0x100] ss:$8 sps:$4 sm:$0xff]  }
 0x149   :  { %v5835_v34 = vpop.f32.mrb[29].mxu1 }
 0x14a   :  { %v5837_v8 = vpop.f32.mrb[30].mxu1 }
 0x14b   :  { %v5839_v35 = vpop.f32.mrb[31].mxu1  ;;  %2883 = vmatpush1.bf16.msra.mxu0 %v4560_v45  ;;  %v4614_v45 = vld [vmem:[%s6104_s5 + $0x8] sm:$0xff]  }
 0x14c   :  { %2965 = vmatprep.subr.bf16.mxu0 %v4565_v46 }
 0x14d   :  { %3662 = vmatmul.mubr.msk.bf16.gmra.mrb[40].mxu1 %vm1431_vm0, %v4901_v31  ;;  %v431_v31 = vlaneseq }
 0x14e   :  { %2309 = vmatprep.mubr.bf16.mxu1 %v4726_v0 }
 0x155   :  { %3663 = vmatmul.mubr.msk.bf16.gmra.mrb[44].mxu1 %vm1431_vm0, %v4936_v42  ;;  %v5858_v42 = vshrl.u32 %v431_v31, 7 }
 0x156   :  { %2319 = vmatprep.mubr.bf16.mxu1 %v4726_v0 }
 0x157   :  { %v437_v48 = vsub.s32 1, %v5858_v42 }
 0x15d   :  { %3664 = vmatmul.mubr.msk.bf16.gmra.mrb[48].mxu1 %vm1431_vm0, %v4971_v53  ;;  %v433_v53 = vsub.s32 0, %v5858_v42 }
 0x15e   :  { %2329 = vmatprep.mubr.bf16.mxu1 %v4726_v0 }
 0x165   :  { %3665 = vmatmul.mubr.msk.bf16.gmra.mrb[52].mxu1 %vm1431_vm0, %v5006_v1  ;;  %v5867_v1 = vrot.slane %v5861_v47, %v433_v53 }
 0x166   :  { %2339 = vmatprep.mubr.bf16.mxu1 %v4726_v0 }
 0x16d   :  { %3666 = vmatmul.mubr.msk.bf16.gmra.mrb[56].mxu1 %vm1431_vm0, %v5047_v16 }
 0x16e   :  { %2349 = vmatprep.mubr.bf16.mxu1 %v4726_v0  ;;  %v5872_v0 = vrot.slane %v5861_v47, %v437_v48 }
 0x175   :  { %3667 = vmatmul.mubr.msk.bf16.gmra.mrb[60].mxu1 %vm1431_vm0, %v5085_v29 }
 0x1cb   :  { %v1716_v16 = vpop.f32.mrb[0].mxu0 }
 0x1cc   :  { %v3892_v29 = vadd.f32 %v1716_v16, %v5867_v1  ;;  %v1718_v49 = vpop.f32.mrb[1].mxu0 }
 0x1cd   :  { %v3894_v50 = vadd.f32 %v1718_v49, %v5872_v0  ;;  %v1720_v51 = vpop.f32.mrb[2].mxu0  ;;  %v4615_v49 = vld [vmem:[%s6104_s5 + $0x50] sm:$0xff]  }
 0x1ce   :  { %v3893_v54 = vadd.f32 %v3892_v29, %v5728_v21  ;;  %v3896_v57 = vadd.f32 %v1720_v51, %v5867_v1  ;;  %v1722_v58 = vpop.f32.mrb[3].mxu0  ;;  %v4612_v21 = vld [vmem:[%s6104_s5] sm:$0xff]  }
 0x1cf   :  { %v3895_v60 = vadd.f32 %v3894_v50, %v5730_v23  ;;  %v3898_v61 = vadd.f32 %v1722_v58, %v5872_v0  ;;  %v4613_v23 = vld [vmem:[%s6104_s5 + $0x48] sm:$0xff]   ;;  %3829 = vmatpush3.bf16.msra.mxu1 %v4612_v21  ;;  %v4568_v29 = vld [vmem:[#allocation5 + $0x114] ss:$8 sps:$4 sm:$0xff]   ;;  %v4616_v58 = vld [vmem:[%s6104_s5 + $0x10] sm:$0xff]  }
 0x1d0   :  { %v3897_v62 = vadd.f32 %v3896_v57, %v5732_v24  ;;  %v2360_v2 = vmax.f32 %v3893_v54, 0.0  ;;  %3830 = vmatprep.subr.bf16.mxu1 %v4613_v23 }
 0x1d1   :  { %v3899_v63 = vadd.f32 %v3898_v61, %v5740_v27  ;;  %v2361_v9 = vmax.f32 %v3895_v60, 0.0 }
 0x1d2   :  { %v2364_v3 = vmax.f32 %v3897_v62, 0.0  ;;  %v4571_v62 = vld [vmem:[#allocation5 + $0x124] ss:$8 sps:$4 sm:$0xff]  }
 0x1d3   :  { %v2365_v10 = vmax.f32 %v3899_v63, 0.0  ;;  %v1726_v12 = vpop.f32.mrb[4].mxu0  ;;  %3831 = vmatpush3.bf16.msra.mxu1 %v4614_v45 }
 0x1d4   :  { %v2424_v24 = vpack.c.bf16 %v2364_v3, %v2360_v2  ;;  %v3900_v27 = vadd.f32 %v1726_v12, %v5867_v1  ;;  %v1728_v36 = vpop.f32.mrb[5].mxu0  ;;  %3832 = vmatprep.subr.bf16.mxu1 %v4615_v49  ;;  %v4618_v12 = vld [vmem:[%s6104_s5 + $0x18] sm:$0xff]   ;;  %v4577_v49 = vld [vmem:[#allocation5 + $0x144] ss:$8 sps:$4 sm:$0xff]  }
 0x1d5   :  { %v3902_v38 = vadd.f32 %v1728_v36, %v5872_v0  ;;  %v1730_v19 = vpop.f32.mrb[6].mxu0  ;;  %v2425_v41 = vpack.c.bf16 %v2365_v10, %v2361_v9  ;;  %v4569_v10 = vld [vmem:[#allocation5 + $0x120] ss:$8 sps:$4 sm:$0xff]  }
 0x1d6   :  { %v3901_v46 = vadd.f32 %v3900_v27, %v5748_v37  ;;  %v3904_v31 = vadd.f32 %v1730_v19, %v5867_v1  ;;  %v1732_v16 = vpop.f32.mrb[7].mxu0  ;;  %v4566_v37 = vld [vmem:[#allocation5 + $0x110] ss:$8 sps:$4 sm:$0xff]   ;;  %v4619_v19 = vld [vmem:[%s6104_s5 + $0x60] sm:$0xff]  }
 0x1d7   :  { %v3903_v50 = vadd.f32 %v3902_v38, %v5750_v39  ;;  %v3906_v51 = vadd.f32 %v1732_v16, %v5872_v0  ;;  %2884 = vmatprep.mubr.bf16.mxu0 %v2425_v41  ;;  %v4617_v39 = vld [vmem:[%s6104_s5 + $0x58] sm:$0xff]   ;;  %3833 = vmatpush3.bf16.msra.mxu1 %v4616_v58 }
 0x1d8   :  { %v3905_v54 = vadd.f32 %v3904_v31, %v5752_v40  ;;  %2885 = vmatmul.mubr.bf16.vlgmr.msra.gmra.mrb[32].mxu0 %v2424_v24  ;;  %v2368_v60 = vmax.f32 %v3901_v46, 0.0  ;;  %v4574_v38 = vld [vmem:[#allocation5 + $0x134] ss:$8 sps:$4 sm:$0xff]   ;;  %3834 = vmatprep.subr.bf16.mxu1 %v4617_v39  ;;  %v4572_v46 = vld [vmem:[#allocation5 + $0x130] ss:$8 sps:$4 sm:$0xff]  }
 0x1d9   :  { %v3907_v57 = vadd.f32 %v3906_v51, %v5760_v44  ;;  %2966 = vmatpush1.bf16.msra.mxu0 %v4563_v43  ;;  %v2369_v40 = vmax.f32 %v3903_v50, 0.0  ;;  %v4620_v31 = vld [vmem:[%s6104_s5 + $0x20] sm:$0xff]  }
 0x1da   :  { %v2372_v61 = vmax.f32 %v3905_v54, 0.0  ;;  %2967 = vmatprep.subr.bf16.mxu0 %v4568_v29 }
 0x1db   :  { %v2373_v63 = vmax.f32 %v3907_v57, 0.0  ;;  %v1736_v2 = vpop.f32.mrb[8].mxu0  ;;  %3835 = vmatpush3.bf16.msra.mxu1 %v4618_v12 }
 0x1dc   :  { %v3908_v44 = vadd.f32 %v1736_v2, %v5867_v1  ;;  %v1738_v3 = vpop.f32.mrb[9].mxu0  ;;  %v2428_v4 = vpack.c.bf16 %v2372_v61, %v2368_v60  ;;  %3836 = vmatprep.subr.bf16.mxu1 %v4619_v19  ;;  %v4575_v61 = vld [vmem:[#allocation5 + $0x140] ss:$8 sps:$4 sm:$0xff]   ;;  %v4580_v2 = vld [vmem:[#allocation5 + $0x154] ss:$8 sps:$4 sm:$0xff]  }
 0x1dd   :  { %v3910_v21 = vadd.f32 %v1738_v3, %v5872_v0  ;;  %v1740_v23 = vpop.f32.mrb[10].mxu0  ;;  %v2429_v9 = vpack.c.bf16 %v2373_v63, %v2369_v40  ;;  %2968 = vmatpush1.bf16.msra.mxu0 %v4566_v37 }
 0x1de   :  { %v3909_v24 = vadd.f32 %v3908_v44, %v5768_v52  ;;  %v3912_v27 = vadd.f32 %v1740_v23, %v5867_v1  ;;  %v1742_v36 = vpop.f32.mrb[11].mxu0  ;;  %2969 = vmatprep.subr.bf16.mxu0 %v4571_v62  ;;  %v4622_v62 = vld [vmem:[%s6104_s5 + $0x28] sm:$0xff]   ;;  %v4623_v44 = vld [vmem:[%s6104_s5 + $0x70] sm:$0xff]  }
 0x1df   :  { %v3911_v41 = vadd.f32 %v3910_v21, %v5770_v55  ;;  %v3914_v43 = vadd.f32 %v1742_v36, %v5872_v0  ;;  %2894 = vmatprep.mubr.bf16.mxu0 %v2429_v9  ;;  %v4621_v55 = vld [vmem:[%s6104_s5 + $0x68] sm:$0xff]   ;;  %3837 = vmatpush3.bf16.msra.mxu1 %v4620_v31  ;;  %v4578_v23 = vld [vmem:[#allocation5 + $0x150] ss:$8 sps:$4 sm:$0xff]  }
 0x1e0   :  { %v3913_v45 = vadd.f32 %v3912_v27, %v5772_v56  ;;  %2895 = vmatmul.mubr.bf16.gmra.mrb[36].mxu0 %v2428_v4  ;;  %v2376_v16 = vmax.f32 %v3909_v24, 0.0  ;;  %3838 = vmatprep.subr.bf16.mxu1 %v4621_v55  ;;  %v4624_v9 = vld [vmem:[%s6104_s5 + $0x30] sm:$0xff]  }
 0x1e1   :  { %v3915_v52 = vadd.f32 %v3914_v43, %v5780_v59  ;;  %2970 = vmatpush1.bf16.msra.mxu0 %v4569_v10  ;;  %v2377_v56 = vmax.f32 %v3911_v41, 0.0  ;;  %v4583_v24 = vld [vmem:[#allocation5 + $0x164] ss:$8 sps:$4 sm:$0xff]  }
 0x1e2   :  { %v2380_v29 = vmax.f32 %v3913_v45, 0.0  ;;  %2971 = vmatprep.subr.bf16.mxu0 %v4574_v38  ;;  %v4581_v45 = vld [vmem:[#allocation5 + $0x160] ss:$8 sps:$4 sm:$0xff]  }
 0x1e3   :  { %v2381_v50 = vmax.f32 %v3915_v52, 0.0  ;;  %v1746_v51 = vpop.f32.mrb[12].mxu0  ;;  %3839 = vmatpush3.bf16.msra.mxu1 %v4622_v62 }
 0x1e4   :  { %v3916_v59 = vadd.f32 %v1746_v51, %v5867_v1  ;;  %v1748_v54 = vpop.f32.mrb[13].mxu0  ;;  %v2432_v57 = vpack.c.bf16 %v2380_v29, %v2376_v16  ;;  %3840 = vmatprep.subr.bf16.mxu1 %v4623_v44  ;;  %v4586_v16 = vld [vmem:[#allocation5 + $0x174] ss:$8 sps:$4 sm:$0xff]  }
 0x1e5   :  { %v3918_v37 = vadd.f32 %v1748_v54, %v5872_v0  ;;  %v1750_v58 = vpop.f32.mrb[14].mxu0  ;;  %v2433_v60 = vpack.c.bf16 %v2381_v50, %v2377_v56  ;;  %2972 = vmatpush1.bf16.msra.mxu0 %v4572_v46  ;;  %v4584_v50 = vld [vmem:[#allocation5 + $0x170] ss:$8 sps:$4 sm:$0xff]  }
 0x1e6   :  { %v3917_v39 = vadd.f32 %v3916_v59, %v5788_v5  ;;  %v3920_v40 = vadd.f32 %v1750_v58, %v5867_v1  ;;  %v1752_v63 = vpop.f32.mrb[15].mxu0  ;;  %2973 = vmatprep.subr.bf16.mxu0 %v4577_v49 }
 0x1e7   :  { %v3919_v3 = vadd.f32 %v3918_v37, %v5790_v6  ;;  %v3922_v4 = vadd.f32 %v1752_v63, %v5872_v0  ;;  %2904 = vmatprep.mubr.bf16.mxu0 %v2433_v60  ;;  %3841 = vmatpush3.bf16.msra.mxu1 %v4624_v9 }
 0x1e8   :  { %v3921_v21 = vadd.f32 %v3920_v40, %v5792_v7  ;;  %2905 = vmatmul.mubr.bf16.gmra.mrb[40].mxu0 %v2432_v57  ;;  %v2384_v10 = vmax.f32 %v3917_v39, 0.0  ;;  %v4587_v39 = vld [vmem:[#allocation5 + $0x180] ss:$8 sps:$4 sm:$0xff]  }
 0x1e9   :  { %v3923_v5 = vadd.f32 %v3922_v4, %v5800_v11  ;;  %2974 = vmatpush1.bf16.msra.mxu0 %v4575_v61  ;;  %v2385_v6 = vmax.f32 %v3919_v3, 0.0 }
 0x1ea   :  { %v2388_v12 = vmax.f32 %v3921_v21, 0.0  ;;  %2975 = vmatprep.subr.bf16.mxu0 %v4580_v2  ;;  %v4592_v2 = vld [vmem:[#allocation5 + $0x194] ss:$8 sps:$4 sm:$0xff]  }
 0x1eb   :  { %v2389_v27 = vmax.f32 %v3923_v5, 0.0  ;;  %v1756_v36 = vpop.f32.mrb[16].mxu0  ;;  %v4590_v5 = vld [vmem:[#allocation5 + $0x190] ss:$8 sps:$4 sm:$0xff]  }
 0x1ec   :  { %v3924_v7 = vadd.f32 %v1756_v36, %v5867_v1  ;;  %v1758_v38 = vpop.f32.mrb[17].mxu0  ;;  %v2436_v19 = vpack.c.bf16 %v2388_v12, %v2384_v10 }
 0x1ed   :  { %v3926_v11 = vadd.f32 %v1758_v38, %v5872_v0  ;;  %v1760_v41 = vpop.f32.mrb[18].mxu0  ;;  %v2437_v43 = vpack.c.bf16 %v2389_v27, %v2385_v6  ;;  %2976 = vmatpush1.bf16.msra.mxu0 %v4578_v23  ;;  %v4593_v38 = vld [vmem:[#allocation5 + $0x1a0] ss:$8 sps:$4 sm:$0xff]  }
 0x1ee   :  { %v3925_v52 = vadd.f32 %v3924_v7, %v5802_v13  ;;  %v3928_v46 = vadd.f32 %v1760_v41, %v5867_v1  ;;  %v1762_v31 = vpop.f32.mrb[19].mxu0  ;;  %2977 = vmatprep.subr.bf16.mxu0 %v4583_v24  ;;  %v4589_v13 = vld [vmem:[#allocation5 + $0x184] ss:$8 sps:$4 sm:$0xff]   ;;  %v4598_v41 = vld [vmem:[#allocation5 + $0x1b4] ss:$8 sps:$4 sm:$0xff]  }
 0x1ef   :  { %v3927_v29 = vadd.f32 %v3926_v11, %v5804_v14  ;;  %v3930_v49 = vadd.f32 %v1762_v31, %v5872_v0  ;;  %2914 = vmatprep.mubr.bf16.mxu0 %v2437_v43  ;;  %v4596_v31 = vld [vmem:[#allocation5 + $0x1b0] ss:$8 sps:$4 sm:$0xff]  }
 0x1f0   :  { %v3929_v55 = vadd.f32 %v3928_v46, %v5806_v15  ;;  %2915 = vmatmul.mubr.bf16.gmra.mrb[44].mxu0 %v2436_v19  ;;  %v2392_v51 = vmax.f32 %v3925_v52, 0.0 }
 0x1f1   :  { %v3931_v56 = vadd.f32 %v3930_v49, %v5808_v17  ;;  %2978 = vmatpush1.bf16.msra.mxu0 %v4581_v45  ;;  %v2393_v54 = vmax.f32 %v3927_v29, 0.0 }
 0x1f2   :  { %v2396_v59 = vmax.f32 %v3929_v55, 0.0  ;;  %2979 = vmatprep.subr.bf16.mxu0 %v4586_v16 }
 0x1f3   :  { %v2397_v57 = vmax.f32 %v3931_v56, 0.0  ;;  %v1766_v37 = vpop.f32.mrb[20].mxu0 }
 0x1f4   :  { %v3932_v58 = vadd.f32 %v1766_v37, %v5867_v1  ;;  %v1768_v14 = vpop.f32.mrb[21].mxu0  ;;  %v2440_v60 = vpack.c.bf16 %v2396_v59, %v2392_v51 }
 0x1f5   :  { %v3934_v61 = vadd.f32 %v1768_v14, %v5872_v0  ;;  %v1770_v62 = vpop.f32.mrb[22].mxu0  ;;  %v2441_v15 = vpack.c.bf16 %v2397_v57, %v2393_v54  ;;  %2980 = vmatpush1.bf16.msra.mxu0 %v4584_v50  ;;  %v4599_v54 = vld [vmem:[#allocation5 + $0x1c0] ss:$8 sps:$4 sm:$0xff]  }
 0x1f6   :  { %v3933_v17 = vadd.f32 %v3932_v58, %v5811_v18  ;;  %v3936_v40 = vadd.f32 %v1770_v62, %v5867_v1  ;;  %v1772_v63 = vpop.f32.mrb[23].mxu0  ;;  %2981 = vmatprep.subr.bf16.mxu0 %v4589_v13  ;;  %v4595_v18 = vld [vmem:[#allocation5 + $0x1a4] ss:$8 sps:$4 sm:$0xff]   ;;  %v4604_v58 = vld [vmem:[#allocation5 + $0x1d4] ss:$8 sps:$4 sm:$0xff]   ;;  %v441_v62 = vsub.s32 2, %v5858_v42 }
 0x1f7   :  { %v3935_v44 = vadd.f32 %v3934_v61, %v5813_v20  ;;  %v3938_v3 = vadd.f32 %v1772_v63, %v5872_v0  ;;  %2924 = vmatprep.mubr.bf16.mxu0 %v2441_v15 }
 0x1f8   :  { %v3937_v4 = vadd.f32 %v3936_v40, %v5815_v22  ;;  %2925 = vmatmul.mubr.bf16.gmra.mrb[48].mxu0 %v2440_v60  ;;  %v2400_v23 = vmax.f32 %v3933_v17, 0.0  ;;  %v4607_v40 = vld [vmem:[#allocation5 + $0x1e4] ss:$8 sps:$4 sm:$0xff]  }
 0x1f9   :  { %v3939_v21 = vadd.f32 %v3938_v3, %v5817_v25  ;;  %2982 = vmatpush1.bf16.msra.mxu0 %v4587_v39  ;;  %v2401_v10 = vmax.f32 %v3935_v44, 0.0  ;;  %v4602_v39 = vld [vmem:[#allocation5 + $0x1d0] ss:$8 sps:$4 sm:$0xff]   ;;  %v4610_v3 = vld [vmem:[#allocation5 + $0x1f4] ss:$8 sps:$4 sm:$0xff]  }
 0x1fa   :  { %v2404_v9 = vmax.f32 %v3937_v4, 0.0  ;;  %2983 = vmatprep.subr.bf16.mxu0 %v4592_v2 }
 0x1fb   :  { %v2405_v12 = vmax.f32 %v3939_v21, 0.0  ;;  %v1776_v24 = vpop.f32.mrb[24].mxu0 }
 0x1fc   :  { %v3940_v6 = vadd.f32 %v1776_v24, %v5867_v1  ;;  %v1778_v20 = vpop.f32.mrb[25].mxu0  ;;  %v2444_v27 = vpack.c.bf16 %v2404_v9, %v2400_v23 }
 0x1fd   :  { %v3942_v36 = vadd.f32 %v1778_v20, %v5872_v0  ;;  %v1780_v7 = vpop.f32.mrb[26].mxu0  ;;  %v2445_v22 = vpack.c.bf16 %v2405_v12, %v2401_v10  ;;  %2984 = vmatpush1.bf16.msra.mxu0 %v4590_v5 }
 0x1fe   :  { %v3941_v25 = vadd.f32 %v3940_v6, %v5822_v26  ;;  %v3944_v19 = vadd.f32 %v1780_v7, %v5867_v1  ;;  %v1782_v11 = vpop.f32.mrb[27].mxu0  ;;  %2985 = vmatprep.subr.bf16.mxu0 %v4595_v18  ;;  %v4601_v26 = vld [vmem:[#allocation5 + $0x1c4] ss:$8 sps:$4 sm:$0xff]   ;;  %v4608_v18 = vld [vmem:[#allocation5 + $0x1f0] ss:$8 sps:$4 sm:$0xff]  }
 0x1ff   :  { %v3943_v43 = vadd.f32 %v3942_v36, %v5824_v28  ;;  %v3946_v45 = vadd.f32 %v1782_v11, %v5872_v0  ;;  %2934 = vmatprep.mubr.bf16.mxu0 %v2445_v22 }
 0x200   :  { %v3945_v52 = vadd.f32 %v3944_v19, %v5826_v30  ;;  %2935 = vmatmul.mubr.bf16.gmra.mrb[52].mxu0 %v2444_v27  ;;  %v2408_v16 = vmax.f32 %v3941_v25, 0.0 }
 0x201   :  { %v3947_v46 = vadd.f32 %v3946_v45, %v5828_v32  ;;  %2986 = vmatpush1.bf16.msra.mxu0 %v4593_v38  ;;  %v2409_v49 = vmax.f32 %v3943_v43, 0.0 }
 0x202   :  { %v2412_v29 = vmax.f32 %v3945_v52, 0.0  ;;  %2987 = vmatprep.subr.bf16.mxu0 %v4598_v41 }
 0x203   :  { %v2413_v55 = vmax.f32 %v3947_v46, 0.0  ;;  %v1786_v56 = vpop.f32.mrb[28].mxu0 }
 0x204   :  { %v3948_v50 = vadd.f32 %v1786_v56, %v5867_v1  ;;  %v1788_v28 = vpop.f32.mrb[29].mxu0  ;;  %v2448_v51 = vpack.c.bf16 %v2412_v29, %v2408_v16 }
 0x205   :  { %v3950_v59 = vadd.f32 %v1788_v28, %v5872_v0  ;;  %v1790_v13 = vpop.f32.mrb[30].mxu0  ;;  %v2449_v30 = vpack.c.bf16 %v2413_v55, %v2409_v49  ;;  %2988 = vmatpush1.bf16.msra.mxu0 %v4596_v31 }
 0x206   :  { %v3949_v32 = vadd.f32 %v3948_v50, %v5833_v33  ;;  %v3952_v57 = vadd.f32 %v1790_v13, %v5867_v1  ;;  %v1792_v37 = vpop.f32.mrb[31].mxu0  ;;  %2989 = vmatprep.subr.bf16.mxu0 %v4601_v26  ;;  %v445_v33 = vsub.s32 3, %v5858_v42 }
 0x207   :  { %v3951_v14 = vadd.f32 %v3950_v59, %v5835_v34  ;;  %v3954_v60 = vadd.f32 %v1792_v37, %v5872_v0  ;;  %2944 = vmatprep.mubr.bf16.mxu0 %v2449_v30  ;;  %v5983_v0 = vrot.slane %v5861_v47, %v441_v62 }
 0x208   :  { %v3953_v61 = vadd.f32 %v3952_v57, %v5837_v8  ;;  %2945 = vmatmul.mubr.bf16.gmra.mrb[56].mxu0 %v2448_v51  ;;  %v2416_v1 = vmax.f32 %v3949_v32, 0.0  ;;  %v5986_v44 = vrot.slane %v5861_v47, %v445_v33 }
 0x209   :  { %v3955_v15 = vadd.f32 %v3954_v60, %v5839_v35  ;;  %2990 = vmatpush1.bf16.msra.mxu0 %v4599_v54  ;;  %v2417_v63 = vmax.f32 %v3951_v14, 0.0  ;;  %v4605_v35 = vld [vmem:[#allocation5 + $0x1e0] ss:$8 sps:$4 sm:$0xff]  }
 0x20a   :  { %v2420_v17 = vmax.f32 %v3953_v61, 0.0  ;;  %2991 = vmatprep.subr.bf16.mxu0 %v4604_v58 }
 0x20b   :  { %v2421_v34 = vmax.f32 %v3955_v15, 0.0 }
 0x20c   :  { %v2452_v2 = vpack.c.bf16 %v2420_v17, %v2416_v1 }
 0x20d   :  { %v2453_v8 = vpack.c.bf16 %v2421_v34, %v2417_v63  ;;  %2992 = vmatpush1.bf16.msra.mxu0 %v4602_v39 }
 0x20e   :  { %2993 = vmatprep.subr.bf16.mxu0 %v4607_v40 }
 0x20f   :  { %2954 = vmatprep.mubr.bf16.mxu0 %v2453_v8 }
 0x210   :  { %v2281_v4 = vpop.f32.mrb[32].mxu1  ;;  %2955 = vmatmul.mubr.bf16.gmra.mrb[60].mxu0 %v2452_v2 }
 0x211   :  { %v3956_v21 = vadd.f32 %v2281_v4, %v5983_v0  ;;  %v2283_v5 = vpop.f32.mrb[33].mxu1  ;;  %2994 = vmatpush1.bf16.msra.mxu0 %v4605_v35 }
 0x212   :  { %v3957_v23 = vadd.f32 %v2283_v5, %v5986_v44  ;;  %v2285_v9 = vpop.f32.mrb[34].mxu1  ;;  %2995 = vmatprep.subr.bf16.mxu0 %v4610_v3 }
 0x213   :  { %v3958_v10 = vadd.f32 %v2285_v9, %v5983_v0  ;;  %v2287_v12 = vpop.f32.mrb[35].mxu1  ;;  %v2362_v24 = vmax.f32 %v3956_v21, 0.0 }
 0x214   :  { %v3959_v47 = vadd.f32 %v2287_v12, %v5986_v44  ;;  %v2363_v20 = vmax.f32 %v3957_v23, 0.0 }
 0x215   :  { %v2366_v6 = vmax.f32 %v3958_v10, 0.0  ;;  %2996 = vmatpush1.bf16.msra.mxu0 %v4608_v18 }
 0x216   :  { %v2367_v27 = vmax.f32 %v3959_v47, 0.0 }
 0x217   :  { %v2426_v36 = vpack.c.bf16 %v2366_v6, %v2362_v24 }
 0x218   :  { %v2427_v7 = vpack.c.bf16 %v2367_v27, %v2363_v20  ;;  %v2291_v22 = vpop.f32.mrb[36].mxu1 }
 0x219   :  { %v3960_v38 = vadd.f32 %v2291_v22, %v5983_v0  ;;  %v2293_v25 = vpop.f32.mrb[37].mxu1 }
 0x21a   :  { %v3961_v19 = vadd.f32 %v2293_v25, %v5986_v44  ;;  %v2295_v11 = vpop.f32.mrb[38].mxu1  ;;  %2997 = vmatprep.mubr.bf16.mxu0 %v2427_v7 }
 0x21b   :  { %v3962_v41 = vadd.f32 %v2295_v11, %v5983_v0  ;;  %v2297_v43 = vpop.f32.mrb[39].mxu1  ;;  %2998 = vmatmul.mubr.bf16.vlgmr.msra.gmra.mrb[32].mxu0 %v2426_v36  ;;  %v2370_v52 = vmax.f32 %v3960_v38, 0.0 }
 0x21c   :  { %v3963_v45 = vadd.f32 %v2297_v43, %v5986_v44  ;;  %v2371_v31 = vmax.f32 %v3961_v19, 0.0 }
 0x21d   :  { %v2374_v46 = vmax.f32 %v3962_v41, 0.0 }
 0x21e   :  { %v2375_v16 = vmax.f32 %v3963_v45, 0.0 }
 0x21f   :  { %v2430_v29 = vpack.c.bf16 %v2374_v46, %v2370_v52 }
 0x220   :  { %v2431_v26 = vpack.c.bf16 %v2375_v16, %v2371_v31  ;;  %v2301_v49 = vpop.f32.mrb[40].mxu1 }
 0x221   :  { %v3964_v55 = vadd.f32 %v2301_v49, %v5983_v0  ;;  %v2303_v56 = vpop.f32.mrb[41].mxu1 }
 0x222   :  { %v3965_v50 = vadd.f32 %v2303_v56, %v5986_v44  ;;  %v2305_v28 = vpop.f32.mrb[42].mxu1  ;;  %3007 = vmatprep.mubr.bf16.mxu0 %v2431_v26 }
 0x223   :  { %v3966_v51 = vadd.f32 %v2305_v28, %v5983_v0  ;;  %v2307_v59 = vpop.f32.mrb[43].mxu1  ;;  %3008 = vmatmul.mubr.bf16.gmra.mrb[36].mxu0 %v2430_v29  ;;  %v2378_v30 = vmax.f32 %v3964_v55, 0.0 }
 0x224   :  { %v3967_v13 = vadd.f32 %v2307_v59, %v5986_v44  ;;  %v2379_v32 = vmax.f32 %v3965_v50, 0.0 }
 0x225   :  { %v2382_v54 = vmax.f32 %v3966_v51, 0.0 }
 0x226   :  { %v2383_v57 = vmax.f32 %v3967_v13, 0.0 }
 0x227   :  { %v2434_v37 = vpack.c.bf16 %v2382_v54, %v2378_v30 }
 0x228   :  { %v2435_v58 = vpack.c.bf16 %v2383_v57, %v2379_v32  ;;  %v2311_v14 = vpop.f32.mrb[44].mxu1 }
 0x229   :  { %v3968_v60 = vadd.f32 %v2311_v14, %v5983_v0  ;;  %v2313_v61 = vpop.f32.mrb[45].mxu1 }
 0x22a   :  { %v3969_v62 = vadd.f32 %v2313_v61, %v5986_v44  ;;  %v2315_v15 = vpop.f32.mrb[46].mxu1  ;;  %3017 = vmatprep.mubr.bf16.mxu0 %v2435_v58 }
 0x22b   :  { %v3970_v39 = vadd.f32 %v2315_v15, %v5983_v0  ;;  %v2317_v33 = vpop.f32.mrb[47].mxu1  ;;  %3018 = vmatmul.mubr.bf16.gmra.mrb[40].mxu0 %v2434_v37  ;;  %v2386_v17 = vmax.f32 %v3968_v60, 0.0 }
 0x22c   :  { %v3971_v1 = vadd.f32 %v2317_v33, %v5986_v44  ;;  %v2387_v63 = vmax.f32 %v3969_v62, 0.0 }
 0x22d   :  { %v2390_v40 = vmax.f32 %v3970_v39, 0.0 }
 0x22e   :  { %v2391_v34 = vmax.f32 %v3971_v1, 0.0 }
 0x22f   :  { %v2438_v2 = vpack.c.bf16 %v2390_v40, %v2386_v17 }
 0x230   :  { %v2439_v8 = vpack.c.bf16 %v2391_v34, %v2387_v63  ;;  %v2321_v35 = vpop.f32.mrb[48].mxu1  ;;  %v4625_v34 = vld [vmem:[%s6104_s5 + $0x78] sm:$0xff]  }
 0x231   :  { %v3972_v3 = vadd.f32 %v2321_v35, %v5983_v0  ;;  %v2323_v4 = vpop.f32.mrb[49].mxu1  ;;  %3842 = vmatprep.subr.bf16.mxu1 %v4625_v34 }
 0x232   :  { %v3973_v21 = vadd.f32 %v2323_v4, %v5986_v44  ;;  %v2325_v5 = vpop.f32.mrb[50].mxu1  ;;  %3027 = vmatprep.mubr.bf16.mxu0 %v2439_v8 }
 0x233   :  { %v3974_v23 = vadd.f32 %v2325_v5, %v5983_v0  ;;  %v2327_v9 = vpop.f32.mrb[51].mxu1  ;;  %3028 = vmatmul.mubr.bf16.gmra.mrb[44].mxu0 %v2438_v2  ;;  %v2394_v10 = vmax.f32 %v3972_v3, 0.0 }
 0x234   :  { %v3975_v18 = vadd.f32 %v2327_v9, %v5986_v44  ;;  %v2395_v47 = vmax.f32 %v3973_v21, 0.0 }
 0x235   :  { %v2398_v12 = vmax.f32 %v3974_v23, 0.0 }
 0x236   :  { %v2399_v24 = vmax.f32 %v3975_v18, 0.0 }
 0x237   :  { %v2442_v6 = vpack.c.bf16 %v2398_v12, %v2394_v10 }
 0x238   :  { %v2443_v20 = vpack.c.bf16 %v2399_v24, %v2395_v47  ;;  %v2331_v27 = vpop.f32.mrb[52].mxu1 }
 0x239   :  { %v3976_v36 = vadd.f32 %v2331_v27, %v5983_v0  ;;  %v2333_v7 = vpop.f32.mrb[53].mxu1 }
 0x23a   :  { %v3977_v22 = vadd.f32 %v2333_v7, %v5986_v44  ;;  %v2335_v38 = vpop.f32.mrb[54].mxu1  ;;  %3037 = vmatprep.mubr.bf16.mxu0 %v2443_v20 }
 0x23b   :  { %v3978_v25 = vadd.f32 %v2335_v38, %v5983_v0  ;;  %v2337_v19 = vpop.f32.mrb[55].mxu1  ;;  %3038 = vmatmul.mubr.bf16.gmra.mrb[48].mxu0 %v2442_v6  ;;  %v2402_v41 = vmax.f32 %v3976_v36, 0.0 }
 0x23c   :  { %v3979_v11 = vadd.f32 %v2337_v19, %v5986_v44  ;;  %v2403_v45 = vmax.f32 %v3977_v22, 0.0 }
 0x23d   :  { %v2406_v43 = vmax.f32 %v3978_v25, 0.0 }
 0x23e   :  { %v2407_v52 = vmax.f32 %v3979_v11, 0.0 }
 0x23f   :  { %v2446_v46 = vpack.c.bf16 %v2406_v43, %v2402_v41 }
 0x240   :  { %v2447_v31 = vpack.c.bf16 %v2407_v52, %v2403_v45  ;;  %v2341_v16 = vpop.f32.mrb[56].mxu1 }
 0x241   :  { %v3980_v29 = vadd.f32 %v2341_v16, %v5983_v0  ;;  %v2343_v26 = vpop.f32.mrb[57].mxu1 }
 0x242   :  { %v3981_v49 = vadd.f32 %v2343_v26, %v5986_v44  ;;  %v2345_v55 = vpop.f32.mrb[58].mxu1  ;;  %3047 = vmatprep.mubr.bf16.mxu0 %v2447_v31 }
 0x243   :  { %v3982_v56 = vadd.f32 %v2345_v55, %v5983_v0  ;;  %v2347_v50 = vpop.f32.mrb[59].mxu1  ;;  %3048 = vmatmul.mubr.bf16.gmra.mrb[52].mxu0 %v2446_v46  ;;  %v2410_v51 = vmax.f32 %v3980_v29, 0.0 }
 0x244   :  { %v3983_v28 = vadd.f32 %v2347_v50, %v5986_v44  ;;  %v2411_v13 = vmax.f32 %v3981_v49, 0.0 }
 0x245   :  { %v2414_v59 = vmax.f32 %v3982_v56, 0.0 }
 0x246   :  { %v2415_v30 = vmax.f32 %v3983_v28, 0.0 }
 0x247   :  { %v2450_v54 = vpack.c.bf16 %v2414_v59, %v2410_v51 }
 0x248   :  { %v2451_v32 = vpack.c.bf16 %v2415_v30, %v2411_v13  ;;  %v2351_v57 = vpop.f32.mrb[60].mxu1 }
 0x249   :  { %v3984_v37 = vadd.f32 %v2351_v57, %v5983_v0  ;;  %v2353_v58 = vpop.f32.mrb[61].mxu1 }
 0x24a   :  { %v3985_v14 = vadd.f32 %v2353_v58, %v5986_v44  ;;  %v2355_v60 = vpop.f32.mrb[62].mxu1  ;;  %3057 = vmatprep.mubr.bf16.mxu0 %v2451_v32 }
 0x24b   :  { %v3986_v61 = vadd.f32 %v2355_v60, %v5983_v0  ;;  %v2357_v62 = vpop.f32.mrb[63].mxu1  ;;  %3058 = vmatmul.mubr.bf16.gmra.mrb[56].mxu0 %v2450_v54  ;;  %v2418_v39 = vmax.f32 %v3984_v37, 0.0  ;;  %v4626_v0 = vld [vmem:[%s6104_s5 + $0x38] sm:$0xff]  }
 0x24c   :  { %v3987_v15 = vadd.f32 %v2357_v62, %v5986_v44  ;;  %v2419_v1 = vmax.f32 %v3985_v14, 0.0  ;;  %3843 = vmatpush3.bf16.msra.mxu1 %v4626_v0  ;;  %v2520_v44 = vld [vmem:[%s6103_s4] sm:$0x3]  ;;  %s4727_s4 = smov [#allocation8]  }
 0x24d   :  { %v2422_v33 = vmax.f32 %v3986_v61, 0.0  ;;  %v6031_v2 = vrot.slane %v2520_v44, %v433_v53  ;;  %v6035_v8 = vrot.slane %v2520_v44, %v437_v48  ;;  %s3443_s5 = sshll.u32 %s4727_s4, 4  ;;  %s3444_s5 = int_to_ptr.vmem [resolvable:$true] %s3443_s5 }
 0x24e   :  { %v2423_v17 = vmax.f32 %v3987_v15, 0.0  ;;  %s4693_s11 = scalar_lea.vmem %s3444_s5, 1024  ;;  %p4698_p11 = scmp.lt.s32.totalorder %s3444_s5, %s3444_s5 }
 0x24f   :  { %v2454_v40 = vpack.c.bf16 %v2422_v33, %v2418_v39  ;;  %p4694_p10 = scmp.ne.s32.totalorder %s3444_s5, %s4693_s11  ;;  %p4699_p12 = scmp.lt.s32.totalorder %s4693_s11, %s4693_s11 }
 0x250   :  { %v2455_v63 = vpack.c.bf16 %v2423_v17, %v2419_v1 }
 0x251   :  { %p4700_p13 = por %p4699_p12, %p4698_p11 }
 0x252   :  { %3067 = vmatprep.mubr.bf16.mxu0 %v2455_v63 }
 0x253   :  { %3068 = vmatmul.mubr.bf16.gmra.mrb[60].mxu0 %v2454_v40  ;;  %p4701_p0 = pnand %p4700_p13, %p4694_p10 }
 0x2ee   :  { %v2999_v35 = vpop.f32.mrb[32].mxu0 }
 0x2ef   :  { %v3988_v3 = vadd.f32 %v2999_v35, %v6031_v2  ;;  %v3001_v4 = vpop.f32.mrb[33].mxu0 }
 0x2f0   :  { %v3989_v21 = vadd.f32 %v3001_v4, %v6035_v8  ;;  %v3003_v5 = vpop.f32.mrb[34].mxu0 }
 0x2f1   :  { %v3990_v23 = vadd.f32 %v3003_v5, %v6031_v2  ;;  %v3005_v9 = vpop.f32.mrb[35].mxu0  ;;  %v3078_v10 = vmax.f32 %v3988_v3, 0.0 }
 0x2f2   :  { %v3991_v18 = vadd.f32 %v3005_v9, %v6035_v8  ;;  %v3079_v53 = vmax.f32 %v3989_v21, 0.0 }
 0x2f3   :  { %v3080_v12 = vmax.f32 %v3990_v23, 0.0 }
 0x2f4   :  { %v3081_v47 = vmax.f32 %v3991_v18, 0.0 }
 0x2f5   :  { %v3110_v24 = vpack.c.bf16 %v3080_v12, %v3078_v10 }
 0x2f6   :  { %v3111_v42 = vpack.c.bf16 %v3081_v47, %v3079_v53  ;;  %v3009_v48 = vpop.f32.mrb[36].mxu0 }
 0x2f7   :  { %v3992_v6 = vadd.f32 %v3009_v48, %v6031_v2  ;;  %v3011_v20 = vpop.f32.mrb[37].mxu0 }
 0x2f8   :  { %v3993_v27 = vadd.f32 %v3011_v20, %v6035_v8  ;;  %v3013_v36 = vpop.f32.mrb[38].mxu0  ;;  %3293 = vmatprep.mubr.bf16.mxu1 %v3111_v42 }
 0x2f9   :  { %v3994_v7 = vadd.f32 %v3013_v36, %v6031_v2  ;;  %v3015_v22 = vpop.f32.mrb[39].mxu0  ;;  %3294 = vmatmul.mubr.bf16.vlgmr.msra.gmra.mrb[64].mxu1 %v3110_v24  ;;  %v3082_v25 = vmax.f32 %v3992_v6, 0.0 }
 0x2fa   :  { %v3995_v38 = vadd.f32 %v3015_v22, %v6035_v8  ;;  %v3083_v11 = vmax.f32 %v3993_v27, 0.0 }
 0x2fb   :  { %v3084_v19 = vmax.f32 %v3994_v7, 0.0 }
 0x2fc   :  { %v3085_v41 = vmax.f32 %v3995_v38, 0.0 }
 0x2fd   :  { %v3112_v43 = vpack.c.bf16 %v3084_v19, %v3082_v25 }
 0x2fe   :  { %v3113_v45 = vpack.c.bf16 %v3085_v41, %v3083_v11  ;;  %v3019_v52 = vpop.f32.mrb[40].mxu0 }
 0x2ff   :  { %v3996_v46 = vadd.f32 %v3019_v52, %v6031_v2  ;;  %v3021_v31 = vpop.f32.mrb[41].mxu0 }
 0x300   :  { %v3997_v16 = vadd.f32 %v3021_v31, %v6035_v8  ;;  %v3023_v29 = vpop.f32.mrb[42].mxu0  ;;  %3301 = vmatprep.mubr.bf16.mxu1 %v3113_v45 }
 0x301   :  { %v3998_v26 = vadd.f32 %v3023_v29, %v6031_v2  ;;  %v3025_v49 = vpop.f32.mrb[43].mxu0  ;;  %3302 = vmatmul.mubr.bf16.gmra.mrb[68].mxu1 %v3112_v43  ;;  %v3086_v56 = vmax.f32 %v3996_v46, 0.0 }
 0x302   :  { %v3999_v55 = vadd.f32 %v3025_v49, %v6035_v8  ;;  %v3087_v28 = vmax.f32 %v3997_v16, 0.0 }
 0x303   :  { %v3088_v50 = vmax.f32 %v3998_v26, 0.0 }
 0x304   :  { %v3089_v51 = vmax.f32 %v3999_v55, 0.0 }
 0x305   :  { %v3114_v59 = vpack.c.bf16 %v3088_v50, %v3086_v56 }
 0x306   :  { %v3115_v13 = vpack.c.bf16 %v3089_v51, %v3087_v28  ;;  %v3029_v30 = vpop.f32.mrb[44].mxu0 }
 0x307   :  { %v4000_v54 = vadd.f32 %v3029_v30, %v6031_v2  ;;  %v3031_v32 = vpop.f32.mrb[45].mxu0 }
 0x308   :  { %v4001_v57 = vadd.f32 %v3031_v32, %v6035_v8  ;;  %v3033_v37 = vpop.f32.mrb[46].mxu0  ;;  %3309 = vmatprep.mubr.bf16.mxu1 %v3115_v13 }
 0x309   :  { %v4002_v58 = vadd.f32 %v3033_v37, %v6031_v2  ;;  %v3035_v14 = vpop.f32.mrb[47].mxu0  ;;  %3310 = vmatmul.mubr.bf16.gmra.mrb[72].mxu1 %v3114_v59  ;;  %v3090_v61 = vmax.f32 %v4000_v54, 0.0 }
 0x30a   :  { %v4003_v60 = vadd.f32 %v3035_v14, %v6035_v8  ;;  %v3091_v15 = vmax.f32 %v4001_v57, 0.0 }
 0x30b   :  { %v3092_v62 = vmax.f32 %v4002_v58, 0.0 }
 0x30c   :  { %v3093_v39 = vmax.f32 %v4003_v60, 0.0 }
 0x30d   :  { %v3116_v33 = vpack.c.bf16 %v3092_v62, %v3090_v61 }
 0x30e   :  { %v3117_v1 = vpack.c.bf16 %v3093_v39, %v3091_v15  ;;  %v3039_v17 = vpop.f32.mrb[48].mxu0 }
 0x30f   :  { %v4004_v40 = vadd.f32 %v3039_v17, %v6031_v2  ;;  %v3041_v63 = vpop.f32.mrb[49].mxu0 }
 0x310   :  { %v4005_v34 = vadd.f32 %v3041_v63, %v6035_v8  ;;  %v3043_v0 = vpop.f32.mrb[50].mxu0  ;;  %3317 = vmatprep.mubr.bf16.mxu1 %v3117_v1 }
 0x311   :  { %v4006_v44 = vadd.f32 %v3043_v0, %v6031_v2  ;;  %v3045_v35 = vpop.f32.mrb[51].mxu0  ;;  %3318 = vmatmul.mubr.bf16.gmra.mrb[76].mxu1 %v3116_v33  ;;  %v3094_v4 = vmax.f32 %v4004_v40, 0.0  ;;  %v6069_v33 = vld [vmem:[#allocation7] ss:$0 sm:$0xff] }
 0x312   :  { %v4007_v3 = vadd.f32 %v3045_v35, %v6035_v8  ;;  %v3095_v5 = vmax.f32 %v4005_v34, 0.0 }
 0x313   :  { %v3096_v21 = vmax.f32 %v4006_v44, 0.0 }
 0x314   :  { %v3097_v23 = vmax.f32 %v4007_v3, 0.0 }
 0x315   :  { %v3118_v9 = vpack.c.bf16 %v3096_v21, %v3094_v4 }
 0x316   :  { %v3119_v18 = vpack.c.bf16 %v3097_v23, %v3095_v5  ;;  %v3049_v10 = vpop.f32.mrb[52].mxu0 }
 0x317   :  { %v4008_v12 = vadd.f32 %v3049_v10, %v6031_v2  ;;  %v3051_v53 = vpop.f32.mrb[53].mxu0 }
 0x318   :  { %v4009_v47 = vadd.f32 %v3051_v53, %v6035_v8  ;;  %v3053_v24 = vpop.f32.mrb[54].mxu0  ;;  %3325 = vmatprep.mubr.bf16.mxu1 %v3119_v18 }
 0x319   :  { %v4010_v42 = vadd.f32 %v3053_v24, %v6031_v2  ;;  %v3055_v48 = vpop.f32.mrb[55].mxu0  ;;  %3326 = vmatmul.mubr.bf16.gmra.mrb[80].mxu1 %v3118_v9  ;;  %v3098_v20 = vmax.f32 %v4008_v12, 0.0 }
 0x31a   :  { %v4011_v6 = vadd.f32 %v3055_v48, %v6035_v8  ;;  %v3099_v36 = vmax.f32 %v4009_v47, 0.0 }
 0x31b   :  { %v3100_v27 = vmax.f32 %v4010_v42, 0.0 }
 0x31c   :  { %v3101_v7 = vmax.f32 %v4011_v6, 0.0 }
 0x31d   :  { %v3120_v22 = vpack.c.bf16 %v3100_v27, %v3098_v20 }
 0x31e   :  { %v3121_v38 = vpack.c.bf16 %v3101_v7, %v3099_v36  ;;  %v3059_v25 = vpop.f32.mrb[56].mxu0 }
 0x31f   :  { %v4012_v19 = vadd.f32 %v3059_v25, %v6031_v2  ;;  %v3061_v11 = vpop.f32.mrb[57].mxu0 }
 0x320   :  { %v4013_v41 = vadd.f32 %v3061_v11, %v6035_v8  ;;  %v3063_v43 = vpop.f32.mrb[58].mxu0  ;;  %3333 = vmatprep.mubr.bf16.mxu1 %v3121_v38 }
 0x321   :  { %v4014_v45 = vadd.f32 %v3063_v43, %v6031_v2  ;;  %v3065_v52 = vpop.f32.mrb[59].mxu0  ;;  %3334 = vmatmul.mubr.bf16.gmra.mrb[84].mxu1 %v3120_v22  ;;  %v3102_v31 = vmax.f32 %v4012_v19, 0.0 }
 0x322   :  { %v4015_v46 = vadd.f32 %v3065_v52, %v6035_v8  ;;  %v3103_v29 = vmax.f32 %v4013_v41, 0.0 }
 0x323   :  { %v3104_v16 = vmax.f32 %v4014_v45, 0.0 }
 0x324   :  { %v3105_v26 = vmax.f32 %v4015_v46, 0.0 }
 0x325   :  { %v3122_v49 = vpack.c.bf16 %v3104_v16, %v3102_v31 }
 0x326   :  { %v3123_v55 = vpack.c.bf16 %v3105_v26, %v3103_v29  ;;  %v3069_v56 = vpop.f32.mrb[60].mxu0 }
 0x327   :  { %v4016_v50 = vadd.f32 %v3069_v56, %v6031_v2  ;;  %v3071_v28 = vpop.f32.mrb[61].mxu0 }
 0x328   :  { %v4017_v51 = vadd.f32 %v3071_v28, %v6035_v8  ;;  %v3073_v59 = vpop.f32.mrb[62].mxu0  ;;  %3341 = vmatprep.mubr.bf16.mxu1 %v3123_v55 }
 0x329   :  { %v4018_v13 = vadd.f32 %v3073_v59, %v6031_v2  ;;  %v3075_v30 = vpop.f32.mrb[63].mxu0  ;;  %3342 = vmatmul.mubr.bf16.gmra.mrb[88].mxu1 %v3122_v49  ;;  %v3106_v32 = vmax.f32 %v4016_v50, 0.0 }
 0x32a   :  { %v4019_v54 = vadd.f32 %v3075_v30, %v6035_v8  ;;  %v3107_v37 = vmax.f32 %v4017_v51, 0.0 }
 0x32b   :  { %v3108_v57 = vmax.f32 %v4018_v13, 0.0 }
 0x32c   :  { %v3109_v58 = vmax.f32 %v4019_v54, 0.0 }
 0x32d   :  { %v3124_v14 = vpack.c.bf16 %v3108_v57, %v3106_v32 }
 0x32e   :  { %v3125_v60 = vpack.c.bf16 %v3109_v58, %v3107_v37 }
 0x330   :  { %3349 = vmatprep.mubr.bf16.mxu1 %v3125_v60 }
 0x331   :  { %3350 = vmatmul.mubr.bf16.gmra.mrb[92].mxu1 %v3124_v14 }
 0x3cc   :  { %v3844_v61 = vpop.f32.mrb[64].mxu1 }
 0x3cd   :  { %v3845_v62 = vpop.f32.mrb[65].mxu1 }
 0x3ce   :  { %v3846_v15 = vadd.f32 %v3845_v62, %v3844_v61  ;;  %v3847_v39 = vpop.f32.mrb[66].mxu1 }
 0x3cf   :  { %v3848_v1 = vpop.f32.mrb[67].mxu1 }
 0x3d0   :  { %v3849_v2 = vadd.f32 %v3848_v1, %v3847_v39  ;;  %v3296_v17 = vadd.f32 %v3846_v15, %v6069_v33 }
 0x3d2   :  { %v3299_v8 = vadd.f32 %v3849_v2, %v6069_v33 }
 0x3d4   :  { %v3784_v40 = vpack.c.bf16 %v3299_v8, %v3296_v17  ;;  %v3850_v63 = vpop.f32.mrb[68].mxu1 }
 0x3d5   :  { %v3851_v34 = vpop.f32.mrb[69].mxu1 }
 0x3d6   :  { %3785 = vst [vmem:[#allocation8] sm:$0xff] %v3784_v40   ;;  %v3852_v0 = vadd.f32 %v3851_v34, %v3850_v63  ;;  %v3853_v44 = vpop.f32.mrb[70].mxu1 }
 0x3d7   :  { %v3854_v35 = vpop.f32.mrb[71].mxu1 }
 0x3d8   :  { %v3855_v3 = vadd.f32 %v3854_v35, %v3853_v44  ;;  %v3304_v4 = vadd.f32 %v3852_v0, %v6069_v33 }
 0x3da   :  { %v3307_v21 = vadd.f32 %v3855_v3, %v6069_v33 }
 0x3dc   :  { %v3789_v5 = vpack.c.bf16 %v3307_v21, %v3304_v4  ;;  %v3856_v23 = vpop.f32.mrb[72].mxu1 }
 0x3dd   :  { %v3857_v9 = vpop.f32.mrb[73].mxu1 }
 0x3de   :  { %3821 = vst [vmem:[#allocation8 + $0x8] sm:$0xff] %v3789_v5   ;;  %v3858_v18 = vadd.f32 %v3857_v9, %v3856_v23  ;;  %v3859_v10 = vpop.f32.mrb[74].mxu1 }
 0x3df   :  { %v3860_v12 = vpop.f32.mrb[75].mxu1 }
 0x3e0   :  { %v3861_v53 = vadd.f32 %v3860_v12, %v3859_v10  ;;  %v3312_v47 = vadd.f32 %v3858_v18, %v6069_v33 }
 0x3e2   :  { %v3315_v24 = vadd.f32 %v3861_v53, %v6069_v33 }
 0x3e4   :  { %v3794_v42 = vpack.c.bf16 %v3315_v24, %v3312_v47  ;;  %v3862_v48 = vpop.f32.mrb[76].mxu1 }
 0x3e5   :  { %v3863_v6 = vpop.f32.mrb[77].mxu1 }
 0x3e6   :  { %3822 = vst [vmem:[#allocation8 + $0x10] sm:$0xff] %v3794_v42   ;;  %v3864_v20 = vadd.f32 %v3863_v6, %v3862_v48  ;;  %v3865_v27 = vpop.f32.mrb[78].mxu1 }
 0x3e7   :  { %v3866_v36 = vpop.f32.mrb[79].mxu1 }
 0x3e8   :  { %v3867_v7 = vadd.f32 %v3866_v36, %v3865_v27  ;;  %v3320_v22 = vadd.f32 %v3864_v20, %v6069_v33 }
 0x3ea   :  { %v3323_v38 = vadd.f32 %v3867_v7, %v6069_v33 }
 0x3ec   :  { %v3799_v25 = vpack.c.bf16 %v3323_v38, %v3320_v22  ;;  %v3868_v19 = vpop.f32.mrb[80].mxu1 }
 0x3ed   :  { %v3869_v11 = vpop.f32.mrb[81].mxu1 }
 0x3ee   :  { %3823 = vst [vmem:[#allocation8 + $0x18] sm:$0xff] %v3799_v25   ;;  %v3870_v41 = vadd.f32 %v3869_v11, %v3868_v19  ;;  %v3871_v43 = vpop.f32.mrb[82].mxu1 }
 0x3ef   :  { %v3872_v45 = vpop.f32.mrb[83].mxu1 }
 0x3f0   :  { %v3873_v52 = vadd.f32 %v3872_v45, %v3871_v43  ;;  %v3328_v46 = vadd.f32 %v3870_v41, %v6069_v33 }
 0x3f2   :  { %v3331_v31 = vadd.f32 %v3873_v52, %v6069_v33 }
 0x3f4   :  { %v3804_v16 = vpack.c.bf16 %v3331_v31, %v3328_v46  ;;  %v3874_v29 = vpop.f32.mrb[84].mxu1 }
 0x3f5   :  { %v3875_v26 = vpop.f32.mrb[85].mxu1 }
 0x3f6   :  { %3824 = vst [vmem:[#allocation8 + $0x20] sm:$0xff] %v3804_v16   ;;  %v3876_v49 = vadd.f32 %v3875_v26, %v3874_v29  ;;  %v3877_v55 = vpop.f32.mrb[86].mxu1 }
 0x3f7   :  { %v3878_v56 = vpop.f32.mrb[87].mxu1 }
 0x3f8   :  { %v3879_v50 = vadd.f32 %v3878_v56, %v3877_v55  ;;  %v3336_v28 = vadd.f32 %v3876_v49, %v6069_v33 }
 0x3fa   :  { %v3339_v51 = vadd.f32 %v3879_v50, %v6069_v33 }
 0x3fc   :  { %v3809_v59 = vpack.c.bf16 %v3339_v51, %v3336_v28  ;;  %v3880_v13 = vpop.f32.mrb[88].mxu1 }
 0x3fd   :  { %v3881_v30 = vpop.f32.mrb[89].mxu1 }
 0x3fe   :  { %3825 = vst [vmem:[#allocation8 + $0x28] sm:$0xff] %v3809_v59   ;;  %v3882_v54 = vadd.f32 %v3881_v30, %v3880_v13  ;;  %v3883_v32 = vpop.f32.mrb[90].mxu1 }
 0x3ff   :  { %v3884_v57 = vpop.f32.mrb[91].mxu1 }
 0x400   :  { %v3885_v37 = vadd.f32 %v3884_v57, %v3883_v32  ;;  %v3344_v58 = vadd.f32 %v3882_v54, %v6069_v33 }
 0x402   :  { %v3347_v14 = vadd.f32 %v3885_v37, %v6069_v33 }
 0x404   :  { %v3814_v60 = vpack.c.bf16 %v3347_v14, %v3344_v58  ;;  %v3886_v61 = vpop.f32.mrb[92].mxu1 }
 0x405   :  { %v3887_v62 = vpop.f32.mrb[93].mxu1 }
 0x406   :  { %3826 = vst [vmem:[#allocation8 + $0x30] sm:$0xff] %v3814_v60   ;;  %v3888_v15 = vadd.f32 %v3887_v62, %v3886_v61  ;;  %v3889_v39 = vpop.f32.mrb[94].mxu1 }
 0x407   :  { %v3890_v1 = vpop.f32.mrb[95].mxu1 }
 0x408   :  { %v3891_v2 = vadd.f32 %v3890_v1, %v3889_v39  ;;  %v3352_v17 = vadd.f32 %v3888_v15, %v6069_v33 }
 0x40a   :  { %v3355_v8 = vadd.f32 %v3891_v2, %v6069_v33 }
 0x40c   :  { %v3819_v40 = vpack.c.bf16 %v3355_v8, %v3352_v17 }
 0x40e   :  { %3827 = vst [vmem:[#allocation8 + $0x38] sm:$0xff] %v3819_v40  }
 0x40f   :  { %4704 = shalt.err (!%p4701_p0)
}
 0x410   :  { %s4705_s2 = scalar_lea.hbm %s6106_s7, 1024 }
 0x411   :  { %p4706_p1 = scmp.ne.s32.totalorder %s6106_s7, %s4705_s2  ;;  %p4709_p2 = scmp.lt.u32.totalorder %s4705_s2, %s6106_s7 }
 0x413   :  { %p4711_p3 = pnand %p4709_p2, %p4706_p1 }
 0x415   :  { %4714 = shalt.err (!%p4711_p3)
}
 0x416   :  { %s4728_s17 = smov 64   ;;  %s4729_s19 = smov 4  }
 0x417   :  { %3449 = dma.vmem_to_hbm [thread:$0]  %s3444_s5, 1024, %s6106_s7, [#allocation4], %s4728_s17, %s4728_s17, %s4729_s19  }
 0x418   :  { %4719 = dma.done.wait [#allocation4], 1024  }
 0x419   :  { %4720 = vsyncadd [#allocation4], 4294966272 }
 0x41a   :  { %3453 = vsyncpa [#allocation3], 1 }
 0x41b   :  { %3454 = vsyncpa [#allocation6], 1 }
 0x41c   :  { %3455 = vsyncpa [#allocation4], 1 }

</bundles_post_ra>
